<compile_context>
chip_gen: v5e
topology: v5e:2x2
jax: 0.10.0
libtpu: 0.0.40
codegen_flags: <defaults>
</compile_context>

<pallas_src>
import functools

import jax
import jax.numpy as jnp
from jax.experimental import pallas as pl
from jax.experimental.pallas import tpu as pltpu


def _seq2seq_kernel(x2d_ref, w_ex_ref, w_eh_ref, b_enc_ref,
                    w_hfuse_ref, b_hfuse_ref, w_c_ref, b_c_ref,
                    w_dh_ref, out_ref,
                    *, batch, t_in, t_out, matmul_dtype):
    B = batch
    H = w_eh_ref.shape[0]          # encoder hidden size
    O = w_dh_ref.shape[0]          # decoder hidden (output) size
    f32 = jnp.float32

    def mm(a, b):                  # MXU matmul, f32 accumulate
        return jnp.dot(a.astype(matmul_dtype), b, preferred_element_type=f32)

    # Cast weights once (no-op for float32).
    w_ex = w_ex_ref[...].astype(matmul_dtype)       # (Din, 4H)
    w_eh = w_eh_ref[...].astype(matmul_dtype)       # (H,   4H)
    w_hfuse = w_hfuse_ref[...].astype(matmul_dtype) # (H, O + 4O)  [W_h | W_dec_x]
    w_c = w_c_ref[...].astype(matmul_dtype)         # (H, O)
    w_dh = w_dh_ref[...].astype(matmul_dtype)       # (O, 4O)

    # ---------------- encoder ----------------
    # Hoisted input projection: x2d is time-major, row t*B + b == x[b, t, :].
    # Bias is folded in here once (never re-broadcast inside the loop).
    x_proj = mm(x2d_ref[...], w_ex) + b_enc_ref[...]        # (T_in*B, 4H)

    h = jnp.zeros((B, H), f32)
    c = jnp.zeros((B, H), f32)
    for t in range(t_in):          # static unroll (small T_in)
        gates = x_proj[t * B:(t + 1) * B, :] + mm(h, w_eh)  # (B, 4H)
        sig = jax.nn.sigmoid(gates[:, :3 * H])              # fused i/f/o activations
        i_g = sig[:, 0 * H:1 * H]
        f_g = sig[:, 1 * H:2 * H]
        o_g = sig[:, 2 * H:3 * H]
        g_c = jnp.tanh(gates[:, 3 * H:])
        c = f_g * c + i_g * g_c
        h = o_g * jnp.tanh(c)

    # ---------------- decoder ----------------
    # All h-driven decoder projections (hidden->output init + the loop-invariant
    # input-gate term of the decoder cell) fused into one matmul, biases folded.
    hproj = mm(h, w_hfuse) + b_hfuse_ref[...]               # (B, O + 4O)
    hd = hproj[:, :O]                                       # linear_h(h_enc) + b_h
    enc_term = hproj[:, O:]                                 # h_enc @ W_dec_x + b_dec
    cd = mm(c, w_c) + b_c_ref[...]                          # linear_c(c_enc) + b_c

    outs = []
    for t in range(t_out):         # static unroll (small T_out)
        gates = enc_term + mm(hd, w_dh)                     # (B, 4O)
        sig = jax.nn.sigmoid(gates[:, :3 * O])
        i_g = sig[:, 0 * O:1 * O]
        f_g = sig[:, 1 * O:2 * O]
        o_g = sig[:, 2 * O:3 * O]
        g_c = jnp.tanh(gates[:, 3 * O:])
        cd = f_g * cd + i_g * g_c
        hd = o_g * jnp.tanh(cd)
        outs.append(hd)

    # One wide lane-dense store instead of T_out narrow per-step stores.
    out_ref[...] = jnp.concatenate(outs, axis=1)            # (B, T_out*O)


def lstm_seq2seq_pallas(x, params, *, output_seq_len, matmul_dtype=jnp.float32):
    """x: (B, T_in, Din) float32 -> (B, T_out, O) float32."""
    B, T_in, Din = x.shape
    H = params["w_enc_h"].shape[0]
    O = params["w_dec_h"].shape[0]
    T_out = output_seq_len

    # Layout plumbing outside the kernel:
    #   * time-major flatten so the kernel does a single lane-dense
    #     (T_in*B, Din) @ (Din, 4H) input projection and reads contiguous
    #     (B, 4H) row blocks per time step.
    #   * pack the h-driven decoder projections [W_h | W_dec_x] (and biases)
    #     column-wise so the decoder prologue is a single matmul.
    x2d = jnp.transpose(x, (1, 0, 2)).reshape(T_in * B, Din)
    w_hfuse = jnp.concatenate([params["w_h"], params["w_dec_x"]], axis=1)   # (H, 5O)
    b_hfuse = jnp.concatenate([params["b_h"], params["b_dec"]], axis=1)     # (1, 5O)

    args = (x2d, params["w_enc_x"], params["w_enc_h"], params["b_enc"],
            w_hfuse, b_hfuse, params["w_c"], params["b_c"],
            params["w_dec_h"])

    def full(shape):
        nblk = len(shape)
        return pl.BlockSpec(shape, lambda *_, _n=nblk: (0,) * _n,
                            memory_space=pltpu.VMEM)

    # Derive the scoped-VMEM request from the actual resident footprint
    # (everything lives in VMEM with grid=()), with generous headroom.
    resident_bytes = sum(int(a.size) * a.dtype.itemsize for a in args) \
        + B * T_out * O * 4 + T_in * B * 4 * H * 4
    vmem_limit = max(16 << 20, min(2 * resident_bytes + (8 << 20), 100 << 20))

    kern = functools.partial(_seq2seq_kernel, batch=B, t_in=T_in, t_out=T_out,
                             matmul_dtype=matmul_dtype)

    out2d = pl.pallas_call(
        kern,
        out_shape=jax.ShapeDtypeStruct((B, T_out * O), jnp.float32),
        grid=(),
        in_specs=[full(a.shape) for a in args],
        out_specs=full((B, T_out * O)),
        compiler_params=pltpu.CompilerParams(vmem_limit_bytes=int(vmem_limit)),
    )(*args)

    return out2d.reshape(B, T_out, O)


def init_params(key, input_size, hidden_size, output_size):
    """Deterministic synthetic parameters (PyTorch-Linear-style uniform init)."""
    ks = jax.random.split(key, 4)

    def lin(k, fan_in, fan_out):
        bound = 1.0 / jnp.sqrt(fan_in)
        kw, kb = jax.random.split(k)
        w = jax.random.uniform(kw, (fan_in, fan_out), jnp.float32, -bound, bound)
        b = jax.random.uniform(kb, (1, fan_out), jnp.float32, -bound, bound)
        return w, b

    # encoder LSTMCell (4 gates packed [i|f|o|g]), then split by input source
    w_enc, b_enc = lin(ks[0], input_size + hidden_size, 4 * hidden_size)
    # decoder h/c projections
    w_h, b_h = lin(ks[1], hidden_size, output_size)
    w_c, b_c = lin(ks[2], hidden_size, output_size)
    # decoder LSTMCell (input_size=H, hidden_size=O), split by input source
    w_dec, b_dec = lin(ks[3], hidden_size + output_size, 4 * output_size)

    return dict(
        w_enc_x=w_enc[:input_size, :], w_enc_h=w_enc[input_size:, :], b_enc=b_enc,
        w_h=w_h, b_h=b_h, w_c=w_c, b_c=b_c,
        w_dec_x=w_dec[:hidden_size, :], w_dec_h=w_dec[hidden_size:, :], b_dec=b_dec)


def lstm_seq2seq_reference(x, params, *, output_seq_len):
    """Pure-JAX reference mirroring the PyTorch forward (concat formulation)."""
    B = x.shape[0]
    H = params["w_enc_h"].shape[0]
    O = params["w_dec_h"].shape[0]
    w_enc = jnp.concatenate([params["w_enc_x"], params["w_enc_h"]], axis=0)
    w_dec = jnp.concatenate([params["w_dec_x"], params["w_dec_h"]], axis=0)

    h = jnp.zeros((B, H)); c = jnp.zeros((B, H))
    for t in range(x.shape[1]):
        comb = jnp.concatenate([x[:, t, :], h], axis=1)
        g = comb @ w_enc + params["b_enc"]
        i_g, f_g, o_g, g_c = (jax.nn.sigmoid(g[:, :H]), jax.nn.sigmoid(g[:, H:2*H]),
                              jax.nn.sigmoid(g[:, 2*H:3*H]), jnp.tanh(g[:, 3*H:]))
        c = f_g * c + i_g * g_c
        h = o_g * jnp.tanh(c)
    h_enc = h
    hd = h @ params["w_h"] + params["b_h"]
    cd = c @ params["w_c"] + params["b_c"]
    outs = []
    for t in range(output_seq_len):
        comb = jnp.concatenate([h_enc, hd], axis=1)
        g = comb @ w_dec + params["b_dec"]
        i_g, f_g, o_g, g_c = (jax.nn.sigmoid(g[:, :O]), jax.nn.sigmoid(g[:, O:2*O]),
                              jax.nn.sigmoid(g[:, 2*O:3*O]), jnp.tanh(g[:, 3*O:]))
        cd = f_g * cd + i_g * g_c
        hd = o_g * jnp.tanh(cd)
        outs.append(hd)
    return jnp.stack(outs, axis=1)


if __name__ == "__main__":
    # Small shapes implied by the module's forward:
    B, T_in, T_out = 2, 8, 6
    INPUT_SIZE, HIDDEN_SIZE, OUTPUT_SIZE = 4, 32, 16

    key = jax.random.PRNGKey(0)
    k_x, k_p = jax.random.split(key)
    x = jax.random.normal(k_x, (B, T_in, INPUT_SIZE), jnp.float32)
    params = init_params(k_p, INPUT_SIZE, HIDDEN_SIZE, OUTPUT_SIZE)

    run = jax.jit(functools.partial(lstm_seq2seq_pallas, output_seq_len=T_out))
    out = run(x, params)
    out = jax.block_until_ready(out)
    assert out.shape == (B, T_out, OUTPUT_SIZE), out.shape

    ref = lstm_seq2seq_reference(x, params, output_seq_len=T_out)
    assert jnp.allclose(out, ref, atol=5e-5, rtol=5e-5), float(jnp.max(jnp.abs(out - ref)))

    print("KERNEL_OK")
</pallas_src>

<mosaic_0001>
module attributes {stable_mosaic.version = 11 : i64} {
  func.func @_seq2seq_kernel(%arg0: memref<16x4xf32, #tpu.memory_space<vmem>>, %arg1: memref<4x128xf32, #tpu.memory_space<vmem>>, %arg2: memref<32x128xf32, #tpu.memory_space<vmem>>, %arg3: memref<1x128xf32, #tpu.memory_space<vmem>>, %arg4: memref<32x80xf32, #tpu.memory_space<vmem>>, %arg5: memref<1x80xf32, #tpu.memory_space<vmem>>, %arg6: memref<32x16xf32, #tpu.memory_space<vmem>>, %arg7: memref<1x16xf32, #tpu.memory_space<vmem>>, %arg8: memref<16x64xf32, #tpu.memory_space<vmem>>, %arg9: memref<2x96xf32, #tpu.memory_space<vmem>>) attributes {dimension_semantics = [], scalar_prefetch = 0 : i64, scratch_operands = 0 : i64, tpu.core_type = #tpu.core_type<tc>} {
    %c0 = arith.constant 0 : index
    %c0_0 = arith.constant 0 : index
    %0 = vector.load %arg1[%c0, %c0_0] : memref<4x128xf32, #tpu.memory_space<vmem>>, vector<4x128xf32>
    %c0_1 = arith.constant 0 : index
    %c0_2 = arith.constant 0 : index
    %1 = vector.load %arg2[%c0_1, %c0_2] : memref<32x128xf32, #tpu.memory_space<vmem>>, vector<32x128xf32>
    %c0_3 = arith.constant 0 : index
    %c0_4 = arith.constant 0 : index
    %2 = vector.load %arg4[%c0_3, %c0_4] : memref<32x80xf32, #tpu.memory_space<vmem>>, vector<32x80xf32>
    %c0_5 = arith.constant 0 : index
    %c0_6 = arith.constant 0 : index
    %3 = vector.load %arg6[%c0_5, %c0_6] : memref<32x16xf32, #tpu.memory_space<vmem>>, vector<32x16xf32>
    %c0_7 = arith.constant 0 : index
    %c0_8 = arith.constant 0 : index
    %4 = vector.load %arg8[%c0_7, %c0_8] : memref<16x64xf32, #tpu.memory_space<vmem>>, vector<16x64xf32>
    %c0_9 = arith.constant 0 : index
    %c0_10 = arith.constant 0 : index
    %5 = vector.load %arg0[%c0_9, %c0_10] : memref<16x4xf32, #tpu.memory_space<vmem>>, vector<16x4xf32>
    %cst = arith.constant dense<0.000000e+00> : vector<16x128xf32>
    %6 = tpu.matmul %5, %0, %cst {dimension_numbers = #tpu.dot_dimension_numbers<[1], [0], [0], [1], [0, 0, 1, 1], [], []>} : vector<16x4xf32>, vector<4x128xf32>, vector<16x128xf32> -> vector<16x128xf32>
    %c0_11 = arith.constant 0 : index
    %c0_12 = arith.constant 0 : index
    %7 = vector.load %arg3[%c0_11, %c0_12] : memref<1x128xf32, #tpu.memory_space<vmem>>, vector<1x128xf32>
    %8 = vector.broadcast %7 : vector<1x128xf32> to vector<16x128xf32>
    %9 = arith.addf %6, %8 : vector<16x128xf32>
    %cst_13 = arith.constant 0.000000e+00 : f32
    %10 = vector.broadcast %cst_13 : f32 to vector<2x32xf32>
    %cst_14 = arith.constant 0.000000e+00 : f32
    %11 = vector.broadcast %cst_14 : f32 to vector<2x32xf32>
    %12 = vector.extract_strided_slice %9 {offsets = [0, 0], sizes = [2, 128], strides = [1, 1]} : vector<16x128xf32> to vector<2x128xf32>
    %cst_15 = arith.constant dense<0.000000e+00> : vector<2x128xf32>
    %13 = tpu.matmul %10, %1, %cst_15 {dimension_numbers = #tpu.dot_dimension_numbers<[1], [0], [0], [1], [0, 0, 1, 1], [], []>} : vector<2x32xf32>, vector<32x128xf32>, vector<2x128xf32> -> vector<2x128xf32>
    %14 = arith.addf %12, %13 : vector<2x128xf32>
    %15 = vector.extract_strided_slice %14 {offsets = [0, 0], sizes = [2, 96], strides = [1, 1]} : vector<2x128xf32> to vector<2x96xf32>
    %16 = arith.negf %15 : vector<2x96xf32>
    %17 = math.exp %16 : vector<2x96xf32>
    %cst_16 = arith.constant 1.000000e+00 : f32
    %18 = vector.broadcast %cst_16 : f32 to vector<2x96xf32>
    %19 = arith.addf %18, %17 : vector<2x96xf32>
    %20 = arith.divf %18, %19 : vector<2x96xf32>
    %21 = vector.extract_strided_slice %20 {offsets = [0, 0], sizes = [2, 32], strides = [1, 1]} : vector<2x96xf32> to vector<2x32xf32>
    %22 = vector.extract_strided_slice %20 {offsets = [0, 32], sizes = [2, 32], strides = [1, 1]} : vector<2x96xf32> to vector<2x32xf32>
    %23 = vector.extract_strided_slice %20 {offsets = [0, 64], sizes = [2, 32], strides = [1, 1]} : vector<2x96xf32> to vector<2x32xf32>
    %24 = vector.extract_strided_slice %14 {offsets = [0, 96], sizes = [2, 32], strides = [1, 1]} : vector<2x128xf32> to vector<2x32xf32>
    %25 = math.tanh %24 : vector<2x32xf32>
    %26 = arith.mulf %22, %11 : vector<2x32xf32>
    %27 = arith.mulf %21, %25 : vector<2x32xf32>
    %28 = arith.addf %26, %27 : vector<2x32xf32>
    %29 = math.tanh %28 : vector<2x32xf32>
    %30 = arith.mulf %23, %29 : vector<2x32xf32>
    %31 = vector.extract_strided_slice %9 {offsets = [2, 0], sizes = [2, 128], strides = [1, 1]} : vector<16x128xf32> to vector<2x128xf32>
    %cst_17 = arith.constant dense<0.000000e+00> : vector<2x128xf32>
    %32 = tpu.matmul %30, %1, %cst_17 {dimension_numbers = #tpu.dot_dimension_numbers<[1], [0], [0], [1], [0, 0, 1, 1], [], []>} : vector<2x32xf32>, vector<32x128xf32>, vector<2x128xf32> -> vector<2x128xf32>
    %33 = arith.addf %31, %32 : vector<2x128xf32>
    %34 = vector.extract_strided_slice %33 {offsets = [0, 0], sizes = [2, 96], strides = [1, 1]} : vector<2x128xf32> to vector<2x96xf32>
    %35 = arith.negf %34 : vector<2x96xf32>
    %36 = math.exp %35 : vector<2x96xf32>
    %cst_18 = arith.constant 1.000000e+00 : f32
    %37 = vector.broadcast %cst_18 : f32 to vector<2x96xf32>
    %38 = arith.addf %37, %36 : vector<2x96xf32>
    %39 = arith.divf %37, %38 : vector<2x96xf32>
    %40 = vector.extract_strided_slice %39 {offsets = [0, 0], sizes = [2, 32], strides = [1, 1]} : vector<2x96xf32> to vector<2x32xf32>
    %41 = vector.extract_strided_slice %39 {offsets = [0, 32], sizes = [2, 32], strides = [1, 1]} : vector<2x96xf32> to vector<2x32xf32>
    %42 = vector.extract_strided_slice %39 {offsets = [0, 64], sizes = [2, 32], strides = [1, 1]} : vector<2x96xf32> to vector<2x32xf32>
    %43 = vector.extract_strided_slice %33 {offsets = [0, 96], sizes = [2, 32], strides = [1, 1]} : vector<2x128xf32> to vector<2x32xf32>
    %44 = math.tanh %43 : vector<2x32xf32>
    %45 = arith.mulf %41, %28 : vector<2x32xf32>
    %46 = arith.mulf %40, %44 : vector<2x32xf32>
    %47 = arith.addf %45, %46 : vector<2x32xf32>
    %48 = math.tanh %47 : vector<2x32xf32>
    %49 = arith.mulf %42, %48 : vector<2x32xf32>
    %50 = vector.extract_strided_slice %9 {offsets = [4, 0], sizes = [2, 128], strides = [1, 1]} : vector<16x128xf32> to vector<2x128xf32>
    %cst_19 = arith.constant dense<0.000000e+00> : vector<2x128xf32>
    %51 = tpu.matmul %49, %1, %cst_19 {dimension_numbers = #tpu.dot_dimension_numbers<[1], [0], [0], [1], [0, 0, 1, 1], [], []>} : vector<2x32xf32>, vector<32x128xf32>, vector<2x128xf32> -> vector<2x128xf32>
    %52 = arith.addf %50, %51 : vector<2x128xf32>
    %53 = vector.extract_strided_slice %52 {offsets = [0, 0], sizes = [2, 96], strides = [1, 1]} : vector<2x128xf32> to vector<2x96xf32>
    %54 = arith.negf %53 : vector<2x96xf32>
    %55 = math.exp %54 : vector<2x96xf32>
    %cst_20 = arith.constant 1.000000e+00 : f32
    %56 = vector.broadcast %cst_20 : f32 to vector<2x96xf32>
    %57 = arith.addf %56, %55 : vector<2x96xf32>
    %58 = arith.divf %56, %57 : vector<2x96xf32>
    %59 = vector.extract_strided_slice %58 {offsets = [0, 0], sizes = [2, 32], strides = [1, 1]} : vector<2x96xf32> to vector<2x32xf32>
    %60 = vector.extract_strided_slice %58 {offsets = [0, 32], sizes = [2, 32], strides = [1, 1]} : vector<2x96xf32> to vector<2x32xf32>
    %61 = vector.extract_strided_slice %58 {offsets = [0, 64], sizes = [2, 32], strides = [1, 1]} : vector<2x96xf32> to vector<2x32xf32>
    %62 = vector.extract_strided_slice %52 {offsets = [0, 96], sizes = [2, 32], strides = [1, 1]} : vector<2x128xf32> to vector<2x32xf32>
    %63 = math.tanh %62 : vector<2x32xf32>
    %64 = arith.mulf %60, %47 : vector<2x32xf32>
    %65 = arith.mulf %59, %63 : vector<2x32xf32>
    %66 = arith.addf %64, %65 : vector<2x32xf32>
    %67 = math.tanh %66 : vector<2x32xf32>
    %68 = arith.mulf %61, %67 : vector<2x32xf32>
    %69 = vector.extract_strided_slice %9 {offsets = [6, 0], sizes = [2, 128], strides = [1, 1]} : vector<16x128xf32> to vector<2x128xf32>
    %cst_21 = arith.constant dense<0.000000e+00> : vector<2x128xf32>
    %70 = tpu.matmul %68, %1, %cst_21 {dimension_numbers = #tpu.dot_dimension_numbers<[1], [0], [0], [1], [0, 0, 1, 1], [], []>} : vector<2x32xf32>, vector<32x128xf32>, vector<2x128xf32> -> vector<2x128xf32>
    %71 = arith.addf %69, %70 : vector<2x128xf32>
    %72 = vector.extract_strided_slice %71 {offsets = [0, 0], sizes = [2, 96], strides = [1, 1]} : vector<2x128xf32> to vector<2x96xf32>
    %73 = arith.negf %72 : vector<2x96xf32>
    %74 = math.exp %73 : vector<2x96xf32>
    %cst_22 = arith.constant 1.000000e+00 : f32
    %75 = vector.broadcast %cst_22 : f32 to vector<2x96xf32>
    %76 = arith.addf %75, %74 : vector<2x96xf32>
    %77 = arith.divf %75, %76 : vector<2x96xf32>
    %78 = vector.extract_strided_slice %77 {offsets = [0, 0], sizes = [2, 32], strides = [1, 1]} : vector<2x96xf32> to vector<2x32xf32>
    %79 = vector.extract_strided_slice %77 {offsets = [0, 32], sizes = [2, 32], strides = [1, 1]} : vector<2x96xf32> to vector<2x32xf32>
    %80 = vector.extract_strided_slice %77 {offsets = [0, 64], sizes = [2, 32], strides = [1, 1]} : vector<2x96xf32> to vector<2x32xf32>
    %81 = vector.extract_strided_slice %71 {offsets = [0, 96], sizes = [2, 32], strides = [1, 1]} : vector<2x128xf32> to vector<2x32xf32>
    %82 = math.tanh %81 : vector<2x32xf32>
    %83 = arith.mulf %79, %66 : vector<2x32xf32>
    %84 = arith.mulf %78, %82 : vector<2x32xf32>
    %85 = arith.addf %83, %84 : vector<2x32xf32>
    %86 = math.tanh %85 : vector<2x32xf32>
    %87 = arith.mulf %80, %86 : vector<2x32xf32>
    %88 = vector.extract_strided_slice %9 {offsets = [8, 0], sizes = [2, 128], strides = [1, 1]} : vector<16x128xf32> to vector<2x128xf32>
    %cst_23 = arith.constant dense<0.000000e+00> : vector<2x128xf32>
    %89 = tpu.matmul %87, %1, %cst_23 {dimension_numbers = #tpu.dot_dimension_numbers<[1], [0], [0], [1], [0, 0, 1, 1], [], []>} : vector<2x32xf32>, vector<32x128xf32>, vector<2x128xf32> -> vector<2x128xf32>
    %90 = arith.addf %88, %89 : vector<2x128xf32>
    %91 = vector.extract_strided_slice %90 {offsets = [0, 0], sizes = [2, 96], strides = [1, 1]} : vector<2x128xf32> to vector<2x96xf32>
    %92 = arith.negf %91 : vector<2x96xf32>
    %93 = math.exp %92 : vector<2x96xf32>
    %cst_24 = arith.constant 1.000000e+00 : f32
    %94 = vector.broadcast %cst_24 : f32 to vector<2x96xf32>
    %95 = arith.addf %94, %93 : vector<2x96xf32>
    %96 = arith.divf %94, %95 : vector<2x96xf32>
    %97 = vector.extract_strided_slice %96 {offsets = [0, 0], sizes = [2, 32], strides = [1, 1]} : vector<2x96xf32> to vector<2x32xf32>
    %98 = vector.extract_strided_slice %96 {offsets = [0, 32], sizes = [2, 32], strides = [1, 1]} : vector<2x96xf32> to vector<2x32xf32>
    %99 = vector.extract_strided_slice %96 {offsets = [0, 64], sizes = [2, 32], strides = [1, 1]} : vector<2x96xf32> to vector<2x32xf32>
    %100 = vector.extract_strided_slice %90 {offsets = [0, 96], sizes = [2, 32], strides = [1, 1]} : vector<2x128xf32> to vector<2x32xf32>
    %101 = math.tanh %100 : vector<2x32xf32>
    %102 = arith.mulf %98, %85 : vector<2x32xf32>
    %103 = arith.mulf %97, %101 : vector<2x32xf32>
    %104 = arith.addf %102, %103 : vector<2x32xf32>
    %105 = math.tanh %104 : vector<2x32xf32>
    %106 = arith.mulf %99, %105 : vector<2x32xf32>
    %107 = vector.extract_strided_slice %9 {offsets = [10, 0], sizes = [2, 128], strides = [1, 1]} : vector<16x128xf32> to vector<2x128xf32>
    %cst_25 = arith.constant dense<0.000000e+00> : vector<2x128xf32>
    %108 = tpu.matmul %106, %1, %cst_25 {dimension_numbers = #tpu.dot_dimension_numbers<[1], [0], [0], [1], [0, 0, 1, 1], [], []>} : vector<2x32xf32>, vector<32x128xf32>, vector<2x128xf32> -> vector<2x128xf32>
    %109 = arith.addf %107, %108 : vector<2x128xf32>
    %110 = vector.extract_strided_slice %109 {offsets = [0, 0], sizes = [2, 96], strides = [1, 1]} : vector<2x128xf32> to vector<2x96xf32>
    %111 = arith.negf %110 : vector<2x96xf32>
    %112 = math.exp %111 : vector<2x96xf32>
    %cst_26 = arith.constant 1.000000e+00 : f32
    %113 = vector.broadcast %cst_26 : f32 to vector<2x96xf32>
    %114 = arith.addf %113, %112 : vector<2x96xf32>
    %115 = arith.divf %113, %114 : vector<2x96xf32>
    %116 = vector.extract_strided_slice %115 {offsets = [0, 0], sizes = [2, 32], strides = [1, 1]} : vector<2x96xf32> to vector<2x32xf32>
    %117 = vector.extract_strided_slice %115 {offsets = [0, 32], sizes = [2, 32], strides = [1, 1]} : vector<2x96xf32> to vector<2x32xf32>
    %118 = vector.extract_strided_slice %115 {offsets = [0, 64], sizes = [2, 32], strides = [1, 1]} : vector<2x96xf32> to vector<2x32xf32>
    %119 = vector.extract_strided_slice %109 {offsets = [0, 96], sizes = [2, 32], strides = [1, 1]} : vector<2x128xf32> to vector<2x32xf32>
    %120 = math.tanh %119 : vector<2x32xf32>
    %121 = arith.mulf %117, %104 : vector<2x32xf32>
    %122 = arith.mulf %116, %120 : vector<2x32xf32>
    %123 = arith.addf %121, %122 : vector<2x32xf32>
    %124 = math.tanh %123 : vector<2x32xf32>
    %125 = arith.mulf %118, %124 : vector<2x32xf32>
    %126 = vector.extract_strided_slice %9 {offsets = [12, 0], sizes = [2, 128], strides = [1, 1]} : vector<16x128xf32> to vector<2x128xf32>
    %cst_27 = arith.constant dense<0.000000e+00> : vector<2x128xf32>
    %127 = tpu.matmul %125, %1, %cst_27 {dimension_numbers = #tpu.dot_dimension_numbers<[1], [0], [0], [1], [0, 0, 1, 1], [], []>} : vector<2x32xf32>, vector<32x128xf32>, vector<2x128xf32> -> vector<2x128xf32>
    %128 = arith.addf %126, %127 : vector<2x128xf32>
    %129 = vector.extract_strided_slice %128 {offsets = [0, 0], sizes = [2, 96], strides = [1, 1]} : vector<2x128xf32> to vector<2x96xf32>
    %130 = arith.negf %129 : vector<2x96xf32>
    %131 = math.exp %130 : vector<2x96xf32>
    %cst_28 = arith.constant 1.000000e+00 : f32
    %132 = vector.broadcast %cst_28 : f32 to vector<2x96xf32>
    %133 = arith.addf %132, %131 : vector<2x96xf32>
    %134 = arith.divf %132, %133 : vector<2x96xf32>
    %135 = vector.extract_strided_slice %134 {offsets = [0, 0], sizes = [2, 32], strides = [1, 1]} : vector<2x96xf32> to vector<2x32xf32>
    %136 = vector.extract_strided_slice %134 {offsets = [0, 32], sizes = [2, 32], strides = [1, 1]} : vector<2x96xf32> to vector<2x32xf32>
    %137 = vector.extract_strided_slice %134 {offsets = [0, 64], sizes = [2, 32], strides = [1, 1]} : vector<2x96xf32> to vector<2x32xf32>
    %138 = vector.extract_strided_slice %128 {offsets = [0, 96], sizes = [2, 32], strides = [1, 1]} : vector<2x128xf32> to vector<2x32xf32>
    %139 = math.tanh %138 : vector<2x32xf32>
    %140 = arith.mulf %136, %123 : vector<2x32xf32>
    %141 = arith.mulf %135, %139 : vector<2x32xf32>
    %142 = arith.addf %140, %141 : vector<2x32xf32>
    %143 = math.tanh %142 : vector<2x32xf32>
    %144 = arith.mulf %137, %143 : vector<2x32xf32>
    %145 = vector.extract_strided_slice %9 {offsets = [14, 0], sizes = [2, 128], strides = [1, 1]} : vector<16x128xf32> to vector<2x128xf32>
    %cst_29 = arith.constant dense<0.000000e+00> : vector<2x128xf32>
    %146 = tpu.matmul %144, %1, %cst_29 {dimension_numbers = #tpu.dot_dimension_numbers<[1], [0], [0], [1], [0, 0, 1, 1], [], []>} : vector<2x32xf32>, vector<32x128xf32>, vector<2x128xf32> -> vector<2x128xf32>
    %147 = arith.addf %145, %146 : vector<2x128xf32>
    %148 = vector.extract_strided_slice %147 {offsets = [0, 0], sizes = [2, 96], strides = [1, 1]} : vector<2x128xf32> to vector<2x96xf32>
    %149 = arith.negf %148 : vector<2x96xf32>
    %150 = math.exp %149 : vector<2x96xf32>
    %cst_30 = arith.constant 1.000000e+00 : f32
    %151 = vector.broadcast %cst_30 : f32 to vector<2x96xf32>
    %152 = arith.addf %151, %150 : vector<2x96xf32>
    %153 = arith.divf %151, %152 : vector<2x96xf32>
    %154 = vector.extract_strided_slice %153 {offsets = [0, 0], sizes = [2, 32], strides = [1, 1]} : vector<2x96xf32> to vector<2x32xf32>
    %155 = vector.extract_strided_slice %153 {offsets = [0, 32], sizes = [2, 32], strides = [1, 1]} : vector<2x96xf32> to vector<2x32xf32>
    %156 = vector.extract_strided_slice %153 {offsets = [0, 64], sizes = [2, 32], strides = [1, 1]} : vector<2x96xf32> to vector<2x32xf32>
    %157 = vector.extract_strided_slice %147 {offsets = [0, 96], sizes = [2, 32], strides = [1, 1]} : vector<2x128xf32> to vector<2x32xf32>
    %158 = math.tanh %157 : vector<2x32xf32>
    %159 = arith.mulf %155, %142 : vector<2x32xf32>
    %160 = arith.mulf %154, %158 : vector<2x32xf32>
    %161 = arith.addf %159, %160 : vector<2x32xf32>
    %162 = math.tanh %161 : vector<2x32xf32>
    %163 = arith.mulf %156, %162 : vector<2x32xf32>
    %cst_31 = arith.constant dense<0.000000e+00> : vector<2x80xf32>
    %164 = tpu.matmul %163, %2, %cst_31 {dimension_numbers = #tpu.dot_dimension_numbers<[1], [0], [0], [1], [0, 0, 1, 1], [], []>} : vector<2x32xf32>, vector<32x80xf32>, vector<2x80xf32> -> vector<2x80xf32>
    %c0_32 = arith.constant 0 : index
    %c0_33 = arith.constant 0 : index
    %165 = vector.load %arg5[%c0_32, %c0_33] : memref<1x80xf32, #tpu.memory_space<vmem>>, vector<1x80xf32>
    %166 = vector.broadcast %165 : vector<1x80xf32> to vector<2x80xf32>
    %167 = arith.addf %164, %166 : vector<2x80xf32>
    %168 = vector.extract_strided_slice %167 {offsets = [0, 0], sizes = [2, 16], strides = [1, 1]} : vector<2x80xf32> to vector<2x16xf32>
    %169 = vector.extract_strided_slice %167 {offsets = [0, 16], sizes = [2, 64], strides = [1, 1]} : vector<2x80xf32> to vector<2x64xf32>
    %cst_34 = arith.constant dense<0.000000e+00> : vector<2x16xf32>
    %170 = tpu.matmul %161, %3, %cst_34 {dimension_numbers = #tpu.dot_dimension_numbers<[1], [0], [0], [1], [0, 0, 1, 1], [], []>} : vector<2x32xf32>, vector<32x16xf32>, vector<2x16xf32> -> vector<2x16xf32>
    %c0_35 = arith.constant 0 : index
    %c0_36 = arith.constant 0 : index
    %171 = vector.load %arg7[%c0_35, %c0_36] : memref<1x16xf32, #tpu.memory_space<vmem>>, vector<1x16xf32>
    %172 = vector.broadcast %171 : vector<1x16xf32> to vector<2x16xf32>
    %173 = arith.addf %170, %172 : vector<2x16xf32>
    %cst_37 = arith.constant dense<0.000000e+00> : vector<2x64xf32>
    %174 = tpu.matmul %168, %4, %cst_37 {dimension_numbers = #tpu.dot_dimension_numbers<[1], [0], [0], [1], [0, 0, 1, 1], [], []>} : vector<2x16xf32>, vector<16x64xf32>, vector<2x64xf32> -> vector<2x64xf32>
    %175 = arith.addf %169, %174 : vector<2x64xf32>
    %176 = vector.extract_strided_slice %175 {offsets = [0, 0], sizes = [2, 48], strides = [1, 1]} : vector<2x64xf32> to vector<2x48xf32>
    %177 = arith.negf %176 : vector<2x48xf32>
    %178 = math.exp %177 : vector<2x48xf32>
    %cst_38 = arith.constant 1.000000e+00 : f32
    %179 = vector.broadcast %cst_38 : f32 to vector<2x48xf32>
    %180 = arith.addf %179, %178 : vector<2x48xf32>
    %181 = arith.divf %179, %180 : vector<2x48xf32>
    %182 = vector.extract_strided_slice %181 {offsets = [0, 0], sizes = [2, 16], strides = [1, 1]} : vector<2x48xf32> to vector<2x16xf32>
    %183 = vector.extract_strided_slice %181 {offsets = [0, 16], sizes = [2, 16], strides = [1, 1]} : vector<2x48xf32> to vector<2x16xf32>
    %184 = vector.extract_strided_slice %181 {offsets = [0, 32], sizes = [2, 16], strides = [1, 1]} : vector<2x48xf32> to vector<2x16xf32>
    %185 = vector.extract_strided_slice %175 {offsets = [0, 48], sizes = [2, 16], strides = [1, 1]} : vector<2x64xf32> to vector<2x16xf32>
    %186 = math.tanh %185 : vector<2x16xf32>
    %187 = arith.mulf %183, %173 : vector<2x16xf32>
    %188 = arith.mulf %182, %186 : vector<2x16xf32>
    %189 = arith.addf %187, %188 : vector<2x16xf32>
    %190 = math.tanh %189 : vector<2x16xf32>
    %191 = arith.mulf %184, %190 : vector<2x16xf32>
    %cst_39 = arith.constant dense<0.000000e+00> : vector<2x64xf32>
    %192 = tpu.matmul %191, %4, %cst_39 {dimension_numbers = #tpu.dot_dimension_numbers<[1], [0], [0], [1], [0, 0, 1, 1], [], []>} : vector<2x16xf32>, vector<16x64xf32>, vector<2x64xf32> -> vector<2x64xf32>
    %193 = arith.addf %169, %192 : vector<2x64xf32>
    %194 = vector.extract_strided_slice %193 {offsets = [0, 0], sizes = [2, 48], strides = [1, 1]} : vector<2x64xf32> to vector<2x48xf32>
    %195 = arith.negf %194 : vector<2x48xf32>
    %196 = math.exp %195 : vector<2x48xf32>
    %cst_40 = arith.constant 1.000000e+00 : f32
    %197 = vector.broadcast %cst_40 : f32 to vector<2x48xf32>
    %198 = arith.addf %197, %196 : vector<2x48xf32>
    %199 = arith.divf %197, %198 : vector<2x48xf32>
    %200 = vector.extract_strided_slice %199 {offsets = [0, 0], sizes = [2, 16], strides = [1, 1]} : vector<2x48xf32> to vector<2x16xf32>
    %201 = vector.extract_strided_slice %199 {offsets = [0, 16], sizes = [2, 16], strides = [1, 1]} : vector<2x48xf32> to vector<2x16xf32>
    %202 = vector.extract_strided_slice %199 {offsets = [0, 32], sizes = [2, 16], strides = [1, 1]} : vector<2x48xf32> to vector<2x16xf32>
    %203 = vector.extract_strided_slice %193 {offsets = [0, 48], sizes = [2, 16], strides = [1, 1]} : vector<2x64xf32> to vector<2x16xf32>
    %204 = math.tanh %203 : vector<2x16xf32>
    %205 = arith.mulf %201, %189 : vector<2x16xf32>
    %206 = arith.mulf %200, %204 : vector<2x16xf32>
    %207 = arith.addf %205, %206 : vector<2x16xf32>
    %208 = math.tanh %207 : vector<2x16xf32>
    %209 = arith.mulf %202, %208 : vector<2x16xf32>
    %cst_41 = arith.constant dense<0.000000e+00> : vector<2x64xf32>
    %210 = tpu.matmul %209, %4, %cst_41 {dimension_numbers = #tpu.dot_dimension_numbers<[1], [0], [0], [1], [0, 0, 1, 1], [], []>} : vector<2x16xf32>, vector<16x64xf32>, vector<2x64xf32> -> vector<2x64xf32>
    %211 = arith.addf %169, %210 : vector<2x64xf32>
    %212 = vector.extract_strided_slice %211 {offsets = [0, 0], sizes = [2, 48], strides = [1, 1]} : vector<2x64xf32> to vector<2x48xf32>
    %213 = arith.negf %212 : vector<2x48xf32>
    %214 = math.exp %213 : vector<2x48xf32>
    %cst_42 = arith.constant 1.000000e+00 : f32
    %215 = vector.broadcast %cst_42 : f32 to vector<2x48xf32>
    %216 = arith.addf %215, %214 : vector<2x48xf32>
    %217 = arith.divf %215, %216 : vector<2x48xf32>
    %218 = vector.extract_strided_slice %217 {offsets = [0, 0], sizes = [2, 16], strides = [1, 1]} : vector<2x48xf32> to vector<2x16xf32>
    %219 = vector.extract_strided_slice %217 {offsets = [0, 16], sizes = [2, 16], strides = [1, 1]} : vector<2x48xf32> to vector<2x16xf32>
    %220 = vector.extract_strided_slice %217 {offsets = [0, 32], sizes = [2, 16], strides = [1, 1]} : vector<2x48xf32> to vector<2x16xf32>
    %221 = vector.extract_strided_slice %211 {offsets = [0, 48], sizes = [2, 16], strides = [1, 1]} : vector<2x64xf32> to vector<2x16xf32>
    %222 = math.tanh %221 : vector<2x16xf32>
    %223 = arith.mulf %219, %207 : vector<2x16xf32>
    %224 = arith.mulf %218, %222 : vector<2x16xf32>
    %225 = arith.addf %223, %224 : vector<2x16xf32>
    %226 = math.tanh %225 : vector<2x16xf32>
    %227 = arith.mulf %220, %226 : vector<2x16xf32>
    %cst_43 = arith.constant dense<0.000000e+00> : vector<2x64xf32>
    %228 = tpu.matmul %227, %4, %cst_43 {dimension_numbers = #tpu.dot_dimension_numbers<[1], [0], [0], [1], [0, 0, 1, 1], [], []>} : vector<2x16xf32>, vector<16x64xf32>, vector<2x64xf32> -> vector<2x64xf32>
    %229 = arith.addf %169, %228 : vector<2x64xf32>
    %230 = vector.extract_strided_slice %229 {offsets = [0, 0], sizes = [2, 48], strides = [1, 1]} : vector<2x64xf32> to vector<2x48xf32>
    %231 = arith.negf %230 : vector<2x48xf32>
    %232 = math.exp %231 : vector<2x48xf32>
    %cst_44 = arith.constant 1.000000e+00 : f32
    %233 = vector.broadcast %cst_44 : f32 to vector<2x48xf32>
    %234 = arith.addf %233, %232 : vector<2x48xf32>
    %235 = arith.divf %233, %234 : vector<2x48xf32>
    %236 = vector.extract_strided_slice %235 {offsets = [0, 0], sizes = [2, 16], strides = [1, 1]} : vector<2x48xf32> to vector<2x16xf32>
    %237 = vector.extract_strided_slice %235 {offsets = [0, 16], sizes = [2, 16], strides = [1, 1]} : vector<2x48xf32> to vector<2x16xf32>
    %238 = vector.extract_strided_slice %235 {offsets = [0, 32], sizes = [2, 16], strides = [1, 1]} : vector<2x48xf32> to vector<2x16xf32>
    %239 = vector.extract_strided_slice %229 {offsets = [0, 48], sizes = [2, 16], strides = [1, 1]} : vector<2x64xf32> to vector<2x16xf32>
    %240 = math.tanh %239 : vector<2x16xf32>
    %241 = arith.mulf %237, %225 : vector<2x16xf32>
    %242 = arith.mulf %236, %240 : vector<2x16xf32>
    %243 = arith.addf %241, %242 : vector<2x16xf32>
    %244 = math.tanh %243 : vector<2x16xf32>
    %245 = arith.mulf %238, %244 : vector<2x16xf32>
    %cst_45 = arith.constant dense<0.000000e+00> : vector<2x64xf32>
    %246 = tpu.matmul %245, %4, %cst_45 {dimension_numbers = #tpu.dot_dimension_numbers<[1], [0], [0], [1], [0, 0, 1, 1], [], []>} : vector<2x16xf32>, vector<16x64xf32>, vector<2x64xf32> -> vector<2x64xf32>
    %247 = arith.addf %169, %246 : vector<2x64xf32>
    %248 = vector.extract_strided_slice %247 {offsets = [0, 0], sizes = [2, 48], strides = [1, 1]} : vector<2x64xf32> to vector<2x48xf32>
    %249 = arith.negf %248 : vector<2x48xf32>
    %250 = math.exp %249 : vector<2x48xf32>
    %cst_46 = arith.constant 1.000000e+00 : f32
    %251 = vector.broadcast %cst_46 : f32 to vector<2x48xf32>
    %252 = arith.addf %251, %250 : vector<2x48xf32>
    %253 = arith.divf %251, %252 : vector<2x48xf32>
    %254 = vector.extract_strided_slice %253 {offsets = [0, 0], sizes = [2, 16], strides = [1, 1]} : vector<2x48xf32> to vector<2x16xf32>
    %255 = vector.extract_strided_slice %253 {offsets = [0, 16], sizes = [2, 16], strides = [1, 1]} : vector<2x48xf32> to vector<2x16xf32>
    %256 = vector.extract_strided_slice %253 {offsets = [0, 32], sizes = [2, 16], strides = [1, 1]} : vector<2x48xf32> to vector<2x16xf32>
    %257 = vector.extract_strided_slice %247 {offsets = [0, 48], sizes = [2, 16], strides = [1, 1]} : vector<2x64xf32> to vector<2x16xf32>
    %258 = math.tanh %257 : vector<2x16xf32>
    %259 = arith.mulf %255, %243 : vector<2x16xf32>
    %260 = arith.mulf %254, %258 : vector<2x16xf32>
    %261 = arith.addf %259, %260 : vector<2x16xf32>
    %262 = math.tanh %261 : vector<2x16xf32>
    %263 = arith.mulf %256, %262 : vector<2x16xf32>
    %cst_47 = arith.constant dense<0.000000e+00> : vector<2x64xf32>
    %264 = tpu.matmul %263, %4, %cst_47 {dimension_numbers = #tpu.dot_dimension_numbers<[1], [0], [0], [1], [0, 0, 1, 1], [], []>} : vector<2x16xf32>, vector<16x64xf32>, vector<2x64xf32> -> vector<2x64xf32>
    %265 = arith.addf %169, %264 : vector<2x64xf32>
    %266 = vector.extract_strided_slice %265 {offsets = [0, 0], sizes = [2, 48], strides = [1, 1]} : vector<2x64xf32> to vector<2x48xf32>
    %267 = arith.negf %266 : vector<2x48xf32>
    %268 = math.exp %267 : vector<2x48xf32>
    %cst_48 = arith.constant 1.000000e+00 : f32
    %269 = vector.broadcast %cst_48 : f32 to vector<2x48xf32>
    %270 = arith.addf %269, %268 : vector<2x48xf32>
    %271 = arith.divf %269, %270 : vector<2x48xf32>
    %272 = vector.extract_strided_slice %271 {offsets = [0, 0], sizes = [2, 16], strides = [1, 1]} : vector<2x48xf32> to vector<2x16xf32>
    %273 = vector.extract_strided_slice %271 {offsets = [0, 16], sizes = [2, 16], strides = [1, 1]} : vector<2x48xf32> to vector<2x16xf32>
    %274 = vector.extract_strided_slice %271 {offsets = [0, 32], sizes = [2, 16], strides = [1, 1]} : vector<2x48xf32> to vector<2x16xf32>
    %275 = vector.extract_strided_slice %265 {offsets = [0, 48], sizes = [2, 16], strides = [1, 1]} : vector<2x64xf32> to vector<2x16xf32>
    %276 = math.tanh %275 : vector<2x16xf32>
    %277 = arith.mulf %273, %261 : vector<2x16xf32>
    %278 = arith.mulf %272, %276 : vector<2x16xf32>
    %279 = arith.addf %277, %278 : vector<2x16xf32>
    %280 = math.tanh %279 : vector<2x16xf32>
    %281 = arith.mulf %274, %280 : vector<2x16xf32>
    %282 = tpu.concatenate %191, %209, %227, %245, %263, %281 in 1 : vector<2x16xf32>, vector<2x16xf32>, vector<2x16xf32>, vector<2x16xf32>, vector<2x16xf32>, vector<2x16xf32> -> vector<2x96xf32>
    %c0_49 = arith.constant 0 : index
    %c0_50 = arith.constant 0 : index
    %283 = vector.load %arg9[%c0_49, %c0_50] : memref<2x96xf32, #tpu.memory_space<vmem>>, vector<2x96xf32>
    tpu.vector_store %arg9[%c0_49, %c0_50], %282 {strides = array<i32>} : memref<2x96xf32, #tpu.memory_space<vmem>>, vector<2x96xf32>,
    return
  }
}

</mosaic_0001>

<bundles_post_ra>
// kernel: lstm_seq2seq_pallas.1
= control target key start
LH: loop header
LB: loop body
LE: loop exit
PB: predicated region body
PF: predicated region fallthrough
CT: control target
= control target key end

     0   :  { %vm60_vm0 = vcmask 1043456   ;;  %vm53_vm1 = vcmask 31744   ;;  %v1281_v6 = vmov 0.0   ;;  %s1282_s21 = smov 32   ;;  %vm87_vm6 = vcmask 261120   ;;  %s1284_s10 = smov 96   ;;  %s1527_s2 = inlined_call_operand.vmem [shape: f32[32,128], index: 2, kind: input, shape index: {}]   ;;  %s1528_s1 = inlined_call_operand.vmem [shape: f32[4,128], index: 1, kind: input, shape index: {}]   ;;  %s1529_s0 = inlined_call_operand.vmem [shape: f32[16,4], index: 0, kind: input, shape index: {}]   ;;  %s1530_s3 = inlined_call_operand.vmem [shape: f32[1,128], index: 3, kind: input, shape index: {}]   ;;  %s1531_s6 = inlined_call_operand.vmem [shape: f32[32,16], index: 6, kind: input, shape index: {}]   ;;  %s1532_s7 = inlined_call_operand.vmem [shape: f32[1,16], index: 7, kind: input, shape index: {}]   ;;  %s1533_s5 = inlined_call_operand.vmem [shape: f32[1,80], index: 5, kind: input, shape index: {}]   ;;  %s1534_s4 = inlined_call_operand.vmem [shape: f32[32,80], index: 4, kind: input, shape index: {}]   ;;  %s1535_s8 = inlined_call_operand.vmem [shape: f32[16,64], index: 8, kind: input, shape index: {}]   ;;  %s1536_s9 = inlined_call_operand.vmem [shape: f32[2,96], index: 9, kind: output, shape index: {}]  }
   0x1   :  { %v36_v0 = vld [vmem:[%s1527_s2 + $0x18] sm:$0xff]  ;;  %v35_v1 = vld [vmem:[%s1527_s2 + $0x10] sm:$0xff]  ;;  %v32_v2 = vld [vmem:[%s1528_s1] sm:$0xf]  ;;  %s1286_s22 = smov 80  }
   0x2   :  { %103 = vmatpush.msra.mxu1 %v36_v0  ;;  %1127 = vmatpush.msk.msra.mxu0 %vm60_vm0, %v32_v2  ;;  %v47_v3 = vld [vmem:[%s1529_s0] sm:$0xff]  ;;  %v34_v4 = vld [vmem:[%s1527_s2 + $0x8] sm:$0xff] }
   0x3   :  { %1128 = vmatmul.msk.f32.vlgmr.msra.gmra.mxu0 %vm53_vm1, %v47_v3  ;;  %166 = vmatpush.msra.mxu2 %v36_v0  ;;  %v33_v5 = vld [vmem:[%s1527_s2] sm:$0xff] }
   0x4   :  { %104 = vmatpush.msra.mxu1 %v35_v1  ;;  %236 = vmatpush.msra.mxu3 %v36_v0  ;;  %v1360_v7 = vld [vmem:[%s1530_s3] ss:$0 sm:$0xff]  ;;  %s1283_s3 = smov 64  }
   0x5   :  { %167 = vmatpush.msra.mxu2 %v35_v1  ;;  %512 = vmatpush.msrb.mxu0 %v36_v0 }
   0x6   :  { %105 = vmatpush.msra.mxu1 %v34_v4  ;;  %237 = vmatpush.msra.mxu3 %v35_v1 }
   0x7   :  { %168 = vmatpush.msra.mxu2 %v34_v4  ;;  %513 = vmatpush.msrb.mxu0 %v35_v1 }
   0x8   :  { %106 = vmatpush.msra.mxu1 %v33_v5  ;;  %238 = vmatpush.msra.mxu3 %v34_v4 }
   0x9   :  { %107 = vmatmul.f32.vlgmr.msra.gmra.mxu1 %v1281_v6  ;;  %169 = vmatpush.msra.mxu2 %v33_v5 }
   0xa   :  { %239 = vmatpush.msra.mxu3 %v33_v5  ;;  %306 = vmatpush.msrb.mxu1 %v36_v0 }
   0xb   :  { %376 = vmatpush.msrb.mxu2 %v36_v0  ;;  %514 = vmatpush.msrb.mxu0 %v34_v4 }
   0xc   :  { %442 = vmatpush.msrb.mxu3 %v36_v0  ;;  %307 = vmatpush.msrb.mxu1 %v35_v1 }
   0xd   :  { %377 = vmatpush.msrb.mxu2 %v35_v1  ;;  %515 = vmatpush.msrb.mxu0 %v33_v5 }
   0xe   :  { %443 = vmatpush.msrb.mxu3 %v35_v1  ;;  %308 = vmatpush.msrb.mxu1 %v34_v4 }
   0xf   :  { %378 = vmatpush.msrb.mxu2 %v34_v4 }
  0x10   :  { %444 = vmatpush.msrb.mxu3 %v34_v4  ;;  %309 = vmatpush.msrb.mxu1 %v33_v5 }
  0x11   :  { %379 = vmatpush.msrb.mxu2 %v33_v5 }
  0x12   :  { %445 = vmatpush.msrb.mxu3 %v33_v5  ;;  %582 = vmatpush.msra.mxu1 %v36_v0 }
  0x14   :  { %583 = vmatpush.msra.mxu1 %v35_v1 }
  0x16   :  { %584 = vmatpush.msra.mxu1 %v34_v4 }
  0x18   :  { %585 = vmatpush.msra.mxu1 %v33_v5 }
  0x80   :  { %v81_v8 = vpop.f32.mrf.mxu0 }
  0x81   :  { %v1363_v9 = vadd.f32 %v1360_v7, %v81_v8 }
  0x86   :  { %v108_v10 = vpop.f32.mrf.mxu1 }
  0x87   :  { %v111_v11 = vadd.f32 %v108_v10, %v1363_v9 }
  0x89   :  { %1169 = vtanh.f32 %v111_v11  ;;  %v1130_v13 = vmul.f32 -1.442695, %v111_v11 }
  0x8b   :  { %1171 = vpow2.f32 %v1130_v13 }
  0x8f   :  { %v1170_v12 = vpop.eup %1169 }
  0x90   :  { %134 = vrot.lane.b32.xlu0 %v1170_v12, %s1282_s21 }
  0x91   :  { %v1172_v14 = vpop.eup %1171 }
  0x92   :  { %v115_v15 = vadd.f32 1.0, %v1172_v14 }
  0x94   :  { %1173 = vrcp.f32 %v115_v15  ;;  %v127_v21 = vand.u32 2147483648, %v115_v15  ;;  %vm121_vm3 = vweird.f32 %v115_v15  ;;  %v125_v22 = vand.u32 2147483647, %v115_v15 }
  0x96   :  { %v128_v24 = vor.u32 1.1754944e-38, %v127_v21  ;;  %vm126_vm5 = vcmp.eq.f32.partialorder %v125_v22, 8.507059e+37 }
  0x9a   :  { %v1174_v16 = vpop.eup %1173 }
  0x9b   :  { %v117_v17 = vmul.f32 %v1174_v16, %v115_v15  ;;  %vm122_vm2 = vweird.f32 %v1174_v16 }
  0x9c   :  { %vm123_vm4 = vmor %vm121_vm3, %vm122_vm2 }
  0x9d   :  { %v118_v18 = vsub.f32 1.0, %v117_v17 }
  0x9f   :  { %v119_v19 = vmul.f32 %v1174_v16, %v118_v18 }
  0xa1   :  { %v120_v20 = vadd.f32 %v1174_v16, %v119_v19 }
  0xa3   :  { %v124_v23 = vsel %vm123_vm4, %v1174_v16, %v120_v20 }
  0xa4   :  { %v129_v26 = vsel %vm126_vm5, %v128_v24, %v124_v23 }
  0xa5   :  { %v132_v28 = vmul.f32 0.0, %v129_v26 }
 0x102   :  { %v135_v25 = vpop.permute.xlu0 %134 }
 0x103   :  { %v137_v27 = vmul.f32 %v135_v25, %v129_v26 }
 0x105   :  { %139 = vrot.lane.b32.xlu0 %v137_v27, %s1282_s21 }
 0x177   :  { %v140_v29 = vpop.permute.xlu0 %139 }
 0x178   :  { %v142_v30 = vadd.f32 %v140_v29, %v132_v28 }
 0x17a   :  { %1175 = vtanh.f32 %v142_v30  ;;  %v199_v54 = vrot.slane %v142_v30, 6 }
 0x180   :  { %v1176_v31 = vpop.eup %1175 }
 0x181   :  { %145 = vrot.lane.b32.xlu1 %v1176_v31, %s1282_s21 }
 0x1f3   :  { %v146_v32 = vpop.permute.xlu1 %145 }
 0x1f4   :  { %v148_v33 = vmul.f32 %v146_v32, %v129_v26 }
 0x1f6   :  { %150 = vrot.lane.b32.xlu1 %v148_v33, %s1283_s3 }
 0x268   :  { %v151_v34 = vpop.permute.xlu1 %150 }
 0x269   :  { %1131 = vmatmul.msk.f32.vlgmr.msra.gmra.mxu2 %vm87_vm6, %v151_v34 }
 0x2ec   :  { %v171_v35 = vpop.f32.mrf.mxu2 }
 0x2ed   :  { %v175_v36 = vrot.slane %v171_v35, 6 }
 0x2ef   :  { %v177_v37 = vadd.f32 %v175_v36, %v1363_v9 }
 0x2f1   :  { %1177 = vtanh.f32 %v177_v37  ;;  %v1132_v39 = vmul.f32 -1.442695, %v177_v37 }
 0x2f3   :  { %1179 = vpow2.f32 %v1132_v39 }
 0x2f7   :  { %v1178_v38 = vpop.eup %1177 }
 0x2f8   :  { %203 = vrot.lane.b32.xlu2 %v1178_v38, %s1282_s21 }
 0x2f9   :  { %v1180_v40 = vpop.eup %1179 }
 0x2fa   :  { %v181_v41 = vadd.f32 1.0, %v1180_v40 }
 0x2fc   :  { %1181 = vrcp.f32 %v181_v41  ;;  %v193_v47 = vand.u32 2147483648, %v181_v41  ;;  %vm187_vm8 = vweird.f32 %v181_v41  ;;  %v191_v48 = vand.u32 2147483647, %v181_v41 }
 0x2fe   :  { %v194_v50 = vor.u32 1.1754944e-38, %v193_v47  ;;  %vm192_vm10 = vcmp.eq.f32.partialorder %v191_v48, 8.507059e+37 }
 0x302   :  { %v1182_v42 = vpop.eup %1181 }
 0x303   :  { %v183_v43 = vmul.f32 %v1182_v42, %v181_v41  ;;  %vm188_vm7 = vweird.f32 %v1182_v42 }
 0x304   :  { %vm189_vm9 = vmor %vm187_vm8, %vm188_vm7 }
 0x305   :  { %v184_v44 = vsub.f32 1.0, %v183_v43 }
 0x307   :  { %v185_v45 = vmul.f32 %v1182_v42, %v184_v44 }
 0x309   :  { %v186_v46 = vadd.f32 %v1182_v42, %v185_v45 }
 0x30b   :  { %v190_v49 = vsel %vm189_vm9, %v1182_v42, %v186_v46 }
 0x30c   :  { %v195_v52 = vsel %vm192_vm10, %v194_v50, %v190_v49 }
 0x30d   :  { %v201_v55 = vmul.f32 %v199_v54, %v195_v52 }
 0x352   :  { %v204_v51 = vpop.permute.xlu2 %203 }
 0x353   :  { %v206_v53 = vmul.f32 %v204_v51, %v195_v52 }
 0x355   :  { %208 = vrot.lane.b32.xlu2 %v206_v53, %s1282_s21 }
 0x3af   :  { %v209_v56 = vpop.permute.xlu2 %208 }
 0x3b0   :  { %v211_v57 = vadd.f32 %v209_v56, %v201_v55  ;;  %v48_v55 = vld [vmem:[%s1529_s0 + $0x8] sm:$0xff] }
 0x3b1   :  { %1129 = vmatmul.msk.f32.gmra.mxu0 %vm53_vm1, %v48_v55 }
 0x3b2   :  { %1183 = vtanh.f32 %v211_v57  ;;  %v269_v20 = vrot.slane %v211_v57, 6 }
 0x3b8   :  { %v1184_v58 = vpop.eup %1183 }
 0x3b9   :  { %214 = vrot.lane.b32.xlu0 %v1184_v58, %s1282_s21 }
 0x42b   :  { %v215_v59 = vpop.permute.xlu0 %214 }
 0x42c   :  { %v217_v60 = vmul.f32 %v215_v59, %v195_v52 }
 0x42e   :  { %v219_v61 = vrot.slane %v217_v60, 2  ;;  %v84_v57 = vpop.f32.mrf.mxu0 }
 0x42f   :  { %v1394_v58 = vadd.f32 %v1360_v7, %v84_v57 }
 0x430   :  { %220 = vrot.lane.b32.xlu1 %v219_v61, %s1283_s3 }
 0x4a2   :  { %v221_v62 = vpop.permute.xlu1 %220 }
 0x4a3   :  { %1133 = vmatmul.msk.f32.vlgmr.msra.gmra.mxu3 %vm87_vm6, %v221_v62 }
 0x526   :  { %v241_v63 = vpop.f32.mrf.mxu3 }
 0x527   :  { %v245_v0 = vrot.slane %v241_v63, 4 }
 0x529   :  { %v247_v1 = vadd.f32 %v245_v0, %v1363_v9 }
 0x52b   :  { %1185 = vtanh.f32 %v247_v1  ;;  %v1134_v3 = vmul.f32 -1.442695, %v247_v1 }
 0x52d   :  { %1187 = vpow2.f32 %v1134_v3 }
 0x531   :  { %v1186_v2 = vpop.eup %1185 }
 0x532   :  { %273 = vrot.lane.b32.xlu2 %v1186_v2, %s1282_s21 }
 0x533   :  { %v1188_v4 = vpop.eup %1187 }
 0x534   :  { %v251_v5 = vadd.f32 1.0, %v1188_v4 }
 0x536   :  { %1189 = vrcp.f32 %v251_v5  ;;  %v263_v13 = vand.u32 2147483648, %v251_v5  ;;  %vm257_vm12 = vweird.f32 %v251_v5  ;;  %v261_v14 = vand.u32 2147483647, %v251_v5 }
 0x538   :  { %v264_v16 = vor.u32 1.1754944e-38, %v263_v13  ;;  %vm262_vm14 = vcmp.eq.f32.partialorder %v261_v14, 8.507059e+37 }
 0x53c   :  { %v1190_v6 = vpop.eup %1189 }
 0x53d   :  { %v253_v8 = vmul.f32 %v1190_v6, %v251_v5  ;;  %vm258_vm11 = vweird.f32 %v1190_v6 }
 0x53e   :  { %vm259_vm13 = vmor %vm257_vm12, %vm258_vm11 }
 0x53f   :  { %v254_v10 = vsub.f32 1.0, %v253_v8 }
 0x541   :  { %v255_v11 = vmul.f32 %v1190_v6, %v254_v10 }
 0x543   :  { %v256_v12 = vadd.f32 %v1190_v6, %v255_v11 }
 0x545   :  { %v260_v15 = vsel %vm259_vm13, %v1190_v6, %v256_v12 }
 0x546   :  { %v265_v18 = vsel %vm262_vm14, %v264_v16, %v260_v15 }
 0x547   :  { %v271_v21 = vmul.f32 %v269_v20, %v265_v18 }
 0x58c   :  { %v274_v17 = vpop.permute.xlu2 %273 }
 0x58d   :  { %v276_v19 = vmul.f32 %v274_v17, %v265_v18 }
 0x58f   :  { %278 = vrot.lane.b32.xlu0 %v276_v19, %s1282_s21 }
 0x601   :  { %v279_v22 = vpop.permute.xlu0 %278 }
 0x602   :  { %v281_v23 = vadd.f32 %v279_v22, %v271_v21 }
 0x604   :  { %1191 = vtanh.f32 %v281_v23  ;;  %v339_v47 = vrot.slane %v281_v23, 6 }
 0x60a   :  { %v1192_v24 = vpop.eup %1191 }
 0x60b   :  { %284 = vrot.lane.b32.xlu1 %v1192_v24, %s1282_s21 }
 0x67d   :  { %v285_v25 = vpop.permute.xlu1 %284 }
 0x67e   :  { %v287_v26 = vmul.f32 %v285_v25, %v265_v18 }
 0x680   :  { %v289_v27 = vrot.slane %v287_v26, 4 }
 0x682   :  { %290 = vrot.lane.b32.xlu2 %v289_v27, %s1283_s3 }
 0x6dc   :  { %v291_v28 = vpop.permute.xlu2 %290 }
 0x6dd   :  { %1135 = vmatmul.msk.f32.vlgmr.msrb.gmra.mxu1 %vm87_vm6, %v291_v28 }
 0x75a   :  { %v311_v29 = vpop.f32.mrf.mxu1 }
 0x75b   :  { %v315_v30 = vrot.slane %v311_v29, 2 }
 0x75d   :  { %v317_v31 = vadd.f32 %v315_v30, %v1363_v9 }
 0x75f   :  { %1193 = vtanh.f32 %v317_v31  ;;  %v1136_v33 = vmul.f32 -1.442695, %v317_v31 }
 0x761   :  { %1195 = vpow2.f32 %v1136_v33 }
 0x765   :  { %v1194_v32 = vpop.eup %1193 }
 0x766   :  { %343 = vrot.lane.b32.xlu0 %v1194_v32, %s1282_s21 }
 0x767   :  { %v1196_v34 = vpop.eup %1195 }
 0x768   :  { %v321_v35 = vadd.f32 1.0, %v1196_v34 }
 0x76a   :  { %1197 = vrcp.f32 %v321_v35  ;;  %v333_v41 = vand.u32 2147483648, %v321_v35  ;;  %vm327_vm0 = vweird.f32 %v321_v35  ;;  %v331_v42 = vand.u32 2147483647, %v321_v35 }
 0x76c   :  { %v334_v43 = vor.u32 1.1754944e-38, %v333_v41  ;;  %vm332_vm3 = vcmp.eq.f32.partialorder %v331_v42, 8.507059e+37 }
 0x770   :  { %v1198_v36 = vpop.eup %1197 }
 0x771   :  { %v323_v37 = vmul.f32 %v1198_v36, %v321_v35  ;;  %vm328_vm15 = vweird.f32 %v1198_v36 }
 0x772   :  { %vm329_vm2 = vmor %vm327_vm0, %vm328_vm15 }
 0x773   :  { %v324_v38 = vsub.f32 1.0, %v323_v37 }
 0x775   :  { %v325_v39 = vmul.f32 %v1198_v36, %v324_v38 }
 0x777   :  { %v326_v40 = vadd.f32 %v1198_v36, %v325_v39 }
 0x779   :  { %v330_v9 = vsel %vm329_vm2, %v1198_v36, %v326_v40 }
 0x77a   :  { %v335_v45 = vsel %vm332_vm3, %v334_v43, %v330_v9 }
 0x77b   :  { %v341_v48 = vmul.f32 %v339_v47, %v335_v45 }
 0x7d8   :  { %v344_v44 = vpop.permute.xlu0 %343 }
 0x7d9   :  { %v346_v46 = vmul.f32 %v344_v44, %v335_v45 }
 0x7db   :  { %348 = vrot.lane.b32.xlu1 %v346_v46, %s1282_s21 }
 0x84d   :  { %v349_v49 = vpop.permute.xlu1 %348 }
 0x84e   :  { %v351_v50 = vadd.f32 %v349_v49, %v341_v48 }
 0x850   :  { %1199 = vtanh.f32 %v351_v50  ;;  %v406_v14 = vrot.slane %v351_v50, 6 }
 0x856   :  { %v1200_v51 = vpop.eup %1199 }
 0x857   :  { %354 = vrot.lane.b32.xlu2 %v1200_v51, %s1282_s21 }
 0x8b1   :  { %v355_v52 = vpop.permute.xlu2 %354 }
 0x8b2   :  { %v357_v53 = vmul.f32 %v355_v52, %v335_v45 }
 0x8b4   :  { %v359_v54 = vrot.slane %v357_v53, 6 }
 0x8b6   :  { %360 = vrot.lane.b32.xlu0 %v359_v54, %s1283_s3 }
 0x928   :  { %v361_v56 = vpop.permute.xlu0 %360 }
 0x929   :  { %1137 = vmatmul.msk.f32.vlgmr.msrb.gmra.mxu2 %vm87_vm6, %v361_v56 }
 0x9ac   :  { %v381_v59 = vpop.f32.mrf.mxu2 }
 0x9ad   :  { %v384_v60 = vadd.f32 %v381_v59, %v1394_v58 }
 0x9af   :  { %1201 = vtanh.f32 %v384_v60  ;;  %v1138_v62 = vmul.f32 -1.442695, %v384_v60 }
 0x9b1   :  { %1203 = vpow2.f32 %v1138_v62 }
 0x9b5   :  { %v1202_v61 = vpop.eup %1201 }
 0x9b6   :  { %410 = vrot.lane.b32.xlu1 %v1202_v61, %s1282_s21 }
 0x9b7   :  { %v1204_v63 = vpop.eup %1203 }
 0x9b8   :  { %v388_v0 = vadd.f32 1.0, %v1204_v63 }
 0x9ba   :  { %1205 = vrcp.f32 %v388_v0  ;;  %v400_v7 = vand.u32 2147483648, %v388_v0  ;;  %vm394_vm4 = vweird.f32 %v388_v0  ;;  %v398_v6 = vand.u32 2147483647, %v388_v0 }
 0x9bc   :  { %v401_v10 = vor.u32 1.1754944e-38, %v400_v7  ;;  %vm399_vm7 = vcmp.eq.f32.partialorder %v398_v6, 8.507059e+37 }
 0x9c0   :  { %v1206_v1 = vpop.eup %1205 }
 0x9c1   :  { %v390_v2 = vmul.f32 %v1206_v1, %v388_v0  ;;  %vm395_vm1 = vweird.f32 %v1206_v1 }
 0x9c2   :  { %vm396_vm5 = vmor %vm394_vm4, %vm395_vm1  ;;  %vm694_vm4 = vcmask 130048  }
 0x9c3   :  { %v391_v3 = vsub.f32 1.0, %v390_v2 }
 0x9c5   :  { %v392_v4 = vmul.f32 %v1206_v1, %v391_v3 }
 0x9c7   :  { %v393_v5 = vadd.f32 %v1206_v1, %v392_v4 }
 0x9c9   :  { %v397_v8 = vsel %vm396_vm5, %v1206_v1, %v393_v5 }
 0x9ca   :  { %v402_v12 = vsel %vm399_vm7, %v401_v10, %v397_v8 }
 0x9cb   :  { %v408_v15 = vmul.f32 %v406_v14, %v402_v12 }
 0xa28   :  { %v411_v11 = vpop.permute.xlu1 %410 }
 0xa29   :  { %v413_v13 = vmul.f32 %v411_v11, %v402_v12 }
 0xa2b   :  { %415 = vrot.lane.b32.xlu2 %v413_v13, %s1282_s21 }
 0xa85   :  { %v416_v16 = vpop.permute.xlu2 %415 }
 0xa86   :  { %v418_v17 = vadd.f32 %v416_v16, %v408_v15 }
 0xa88   :  { %1207 = vtanh.f32 %v418_v17  ;;  %v475_v41 = vrot.slane %v418_v17, 6 }
 0xa8e   :  { %v1208_v18 = vpop.eup %1207 }
 0xa8f   :  { %421 = vrot.lane.b32.xlu0 %v1208_v18, %s1282_s21 }
 0xb01   :  { %v422_v19 = vpop.permute.xlu0 %421 }
 0xb02   :  { %v424_v20 = vmul.f32 %v422_v19, %v402_v12 }
 0xb04   :  { %426 = vrot.lane.b32.xlu1 %v424_v20, %s1283_s3 }
 0xb76   :  { %v427_v21 = vpop.permute.xlu1 %426 }
 0xb77   :  { %1139 = vmatmul.msk.f32.vlgmr.msrb.gmra.mxu3 %vm87_vm6, %v427_v21 }
 0xbfa   :  { %v447_v22 = vpop.f32.mrf.mxu3 }
 0xbfb   :  { %v451_v23 = vrot.slane %v447_v22, 6 }
 0xbfd   :  { %v453_v24 = vadd.f32 %v451_v23, %v1394_v58 }
 0xbff   :  { %1209 = vtanh.f32 %v453_v24  ;;  %v1140_v26 = vmul.f32 -1.442695, %v453_v24 }
 0xc01   :  { %1211 = vpow2.f32 %v1140_v26 }
 0xc05   :  { %v1210_v25 = vpop.eup %1209 }
 0xc06   :  { %479 = vrot.lane.b32.xlu2 %v1210_v25, %s1282_s21 }
 0xc07   :  { %v1212_v27 = vpop.eup %1211 }
 0xc08   :  { %v457_v28 = vadd.f32 1.0, %v1212_v27 }
 0xc0a   :  { %1213 = vrcp.f32 %v457_v28  ;;  %v469_v34 = vand.u32 2147483648, %v457_v28  ;;  %vm463_vm9 = vweird.f32 %v457_v28  ;;  %v467_v35 = vand.u32 2147483647, %v457_v28 }
 0xc0c   :  { %v470_v37 = vor.u32 1.1754944e-38, %v469_v34  ;;  %vm468_vm11 = vcmp.eq.f32.partialorder %v467_v35, 8.507059e+37  ;;  %v43_v34 = vld [vmem:[%s1531_s6 + $0x10] sm:$0xff]  ;;  %v42_v35 = vld [vmem:[%s1531_s6 + $0x8] sm:$0xff] }
 0xc10   :  { %v1214_v29 = vpop.eup %1213 }
 0xc11   :  { %v459_v30 = vmul.f32 %v1214_v29, %v457_v28  ;;  %vm464_vm8 = vweird.f32 %v1214_v29 }
 0xc12   :  { %vm465_vm10 = vmor %vm463_vm9, %vm464_vm8 }
 0xc13   :  { %v460_v31 = vsub.f32 1.0, %v459_v30 }
 0xc15   :  { %v461_v32 = vmul.f32 %v1214_v29, %v460_v31 }
 0xc17   :  { %v462_v33 = vadd.f32 %v1214_v29, %v461_v32 }
 0xc19   :  { %v466_v36 = vsel %vm465_vm10, %v1214_v29, %v462_v33  ;;  %v44_v33 = vld [vmem:[%s1531_s6 + $0x18] sm:$0xff] }
 0xc1a   :  { %v471_v39 = vsel %vm468_vm11, %v470_v37, %v466_v36  ;;  %686 = vmatpush.msra.mxu3 %v44_v33  ;;  %v41_v36 = vld [vmem:[%s1531_s6] sm:$0xff] }
 0xc1b   :  { %v477_v42 = vmul.f32 %v475_v41, %v471_v39 }
 0xc1c   :  { %687 = vmatpush.msra.mxu3 %v43_v34 }
 0xc1e   :  { %688 = vmatpush.msra.mxu3 %v42_v35 }
 0xc20   :  { %689 = vmatpush.msra.mxu3 %v41_v36 }
 0xc60   :  { %v480_v38 = vpop.permute.xlu2 %479 }
 0xc61   :  { %v482_v40 = vmul.f32 %v480_v38, %v471_v39 }
 0xc63   :  { %484 = vrot.lane.b32.xlu0 %v482_v40, %s1282_s21 }
 0xcd5   :  { %v485_v9 = vpop.permute.xlu0 %484 }
 0xcd6   :  { %v487_v43 = vadd.f32 %v485_v9, %v477_v42 }
 0xcd8   :  { %1215 = vtanh.f32 %v487_v43  ;;  %v545_v5 = vrot.slane %v487_v43, 6 }
 0xcde   :  { %v1216_v44 = vpop.eup %1215 }
 0xcdf   :  { %490 = vrot.lane.b32.xlu1 %v1216_v44, %s1282_s21 }
 0xd51   :  { %v491_v45 = vpop.permute.xlu1 %490 }
 0xd52   :  { %v493_v46 = vmul.f32 %v491_v45, %v471_v39 }
 0xd54   :  { %v495_v47 = vrot.slane %v493_v46, 2  ;;  %v40_v46 = vld [vmem:[%s1534_s4 + $0x18] sm:$0xff] }
 0xd55   :  { %656 = vmatpush.msra.mxu2 %v40_v46 }
 0xd56   :  { %496 = vrot.lane.b32.xlu2 %v495_v47, %s1283_s3  ;;  %v39_v47 = vld [vmem:[%s1534_s4 + $0x10] sm:$0xff] }
 0xd57   :  { %657 = vmatpush.msra.mxu2 %v39_v47 }
 0xdb0   :  { %v497_v48 = vpop.permute.xlu2 %496 }
 0xdb1   :  { %1141 = vmatmul.msk.f32.vlgmr.msrb.gmra.mxu0 %vm87_vm6, %v497_v48  ;;  %v38_v48 = vld [vmem:[%s1534_s4 + $0x8] sm:$0xff] }
 0xdb2   :  { %658 = vmatpush.msra.mxu2 %v38_v48 }
 0xe2e   :  { %v517_v49 = vpop.f32.mrf.mxu0 }
 0xe2f   :  { %v521_v50 = vrot.slane %v517_v49, 4  ;;  %v37_v49 = vld [vmem:[%s1534_s4] sm:$0xff] }
 0xe30   :  { %659 = vmatpush.msra.mxu2 %v37_v49 }
 0xe31   :  { %v523_v51 = vadd.f32 %v521_v50, %v1394_v58  ;;  %v1167_v50 = vld [vmem:[%s1532_s7] ss:$0 sm:$0xff] }
 0xe33   :  { %1217 = vtanh.f32 %v523_v51  ;;  %v1142_v53 = vmul.f32 -1.442695, %v523_v51 }
 0xe35   :  { %1219 = vpow2.f32 %v1142_v53 }
 0xe39   :  { %v1218_v52 = vpop.eup %1217 }
 0xe3a   :  { %549 = vrot.lane.b32.xlu0 %v1218_v52, %s1282_s21 }
 0xe3b   :  { %v1220_v54 = vpop.eup %1219 }
 0xe3c   :  { %v527_v55 = vadd.f32 1.0, %v1220_v54  ;;  %v46_v54 = vld [vmem:[%s1535_s8 + $0x8] sm:$0xff] }
 0xe3d   :  { %712 = vmatpush.msra.mxu0 %v46_v54  ;;  %783 = vmatpush.msrb.mxu1 %v46_v54 }
 0xe3e   :  { %1221 = vrcp.f32 %v527_v55  ;;  %v539_v62 = vand.u32 2147483648, %v527_v55  ;;  %vm533_vm13 = vweird.f32 %v527_v55  ;;  %v537_v63 = vand.u32 2147483647, %v527_v55  ;;  %850 = vmatpush.msrb.mxu2 %v46_v54  ;;  %917 = vmatpush.msrb.mxu3 %v46_v54 }
 0xe40   :  { %v540_v1 = vor.u32 1.1754944e-38, %v539_v62  ;;  %vm538_vm15 = vcmp.eq.f32.partialorder %v537_v63, 8.507059e+37 }
 0xe44   :  { %v1222_v56 = vpop.eup %1221 }
 0xe45   :  { %v529_v57 = vmul.f32 %v1222_v56, %v527_v55  ;;  %vm534_vm12 = vweird.f32 %v1222_v56  ;;  %v45_v55 = vld [vmem:[%s1535_s8] sm:$0xff]  ;;  %s1285_s8 = smov 16  }
 0xe46   :  { %vm535_vm14 = vmor %vm533_vm13, %vm534_vm12  ;;  %713 = vmatpush.msra.mxu0 %v45_v55  ;;  %784 = vmatpush.msrb.mxu1 %v45_v55 }
 0xe47   :  { %v530_v59 = vsub.f32 1.0, %v529_v57  ;;  %851 = vmatpush.msrb.mxu2 %v45_v55  ;;  %918 = vmatpush.msrb.mxu3 %v45_v55 }
 0xe48   :  { %984 = vmatpush.msrb.mxu0 %v46_v54 }
 0xe49   :  { %v531_v60 = vmul.f32 %v1222_v56, %v530_v59 }
 0xe4a   :  { %985 = vmatpush.msrb.mxu0 %v45_v55 }
 0xe4b   :  { %v532_v61 = vadd.f32 %v1222_v56, %v531_v60 }
 0xe4d   :  { %v536_v0 = vsel %vm535_vm14, %v1222_v56, %v532_v61  ;;  %v1168_v56 = vld [vmem:[%s1533_s5] ss:$0 sm:$0xff]  ;;  %s1287_s5 = smov 112  }
 0xe4e   :  { %v541_v3 = vsel %vm538_vm15, %v540_v1, %v536_v0 }
 0xe4f   :  { %v547_v7 = vmul.f32 %v545_v5, %v541_v3 }
 0xeac   :  { %v550_v2 = vpop.permute.xlu0 %549 }
 0xead   :  { %v552_v4 = vmul.f32 %v550_v2, %v541_v3 }
 0xeaf   :  { %554 = vrot.lane.b32.xlu1 %v552_v4, %s1282_s21 }
 0xf21   :  { %v555_v6 = vpop.permute.xlu1 %554 }
 0xf22   :  { %v557_v8 = vadd.f32 %v555_v6, %v547_v7 }
 0xf24   :  { %1223 = vtanh.f32 %v557_v8  ;;  %v615_v37 = vrot.slane %v557_v8, 6 }
 0xf2a   :  { %v1224_v10 = vpop.eup %1223 }
 0xf2b   :  { %560 = vrot.lane.b32.xlu2 %v1224_v10, %s1282_s21 }
 0xf85   :  { %v561_v11 = vpop.permute.xlu2 %560 }
 0xf86   :  { %v563_v12 = vmul.f32 %v561_v11, %v541_v3 }
 0xf88   :  { %v565_v13 = vrot.slane %v563_v12, 4 }
 0xf8a   :  { %566 = vrot.lane.b32.xlu0 %v565_v13, %s1283_s3 }
 0xffc   :  { %v567_v14 = vpop.permute.xlu0 %566 }
 0xffd   :  { %1143 = vmatmul.msk.f32.vlgmr.msra.gmra.mxu1 %vm87_vm6, %v567_v14 }
 0xffe   :  { %1051 = vmatpush.msra.mxu1 %v46_v54 }
0x1000   :  { %1052 = vmatpush.msra.mxu1 %v45_v55 }
0x107a   :  { %v587_v15 = vpop.f32.mrf.mxu1 }
0x107b   :  { %v591_v16 = vrot.slane %v587_v15, 2 }
0x107d   :  { %v593_v17 = vadd.f32 %v591_v16, %v1394_v58 }
0x107f   :  { %1225 = vtanh.f32 %v593_v17  ;;  %v1144_v19 = vmul.f32 -1.442695, %v593_v17 }
0x1081   :  { %1227 = vpow2.f32 %v1144_v19 }
0x1085   :  { %v1226_v18 = vpop.eup %1225 }
0x1086   :  { %619 = vrot.lane.b32.xlu1 %v1226_v18, %s1282_s21 }
0x1087   :  { %v1228_v20 = vpop.eup %1227 }
0x1088   :  { %v597_v21 = vadd.f32 1.0, %v1228_v20 }
0x108a   :  { %1229 = vrcp.f32 %v597_v21  ;;  %v609_v27 = vand.u32 2147483648, %v597_v21  ;;  %vm603_vm2 = vweird.f32 %v597_v21  ;;  %v607_v28 = vand.u32 2147483647, %v597_v21 }
0x108c   :  { %v610_v29 = vor.u32 1.1754944e-38, %v609_v27  ;;  %vm608_vm1 = vcmp.eq.f32.partialorder %v607_v28, 8.507059e+37 }
0x1090   :  { %v1230_v22 = vpop.eup %1229 }
0x1091   :  { %v599_v23 = vmul.f32 %v1230_v22, %v597_v21  ;;  %vm604_vm0 = vweird.f32 %v1230_v22 }
0x1092   :  { %vm605_vm3 = vmor %vm603_vm2, %vm604_vm0 }
0x1093   :  { %v600_v24 = vsub.f32 1.0, %v599_v23 }
0x1095   :  { %v601_v25 = vmul.f32 %v1230_v22, %v600_v24 }
0x1097   :  { %v602_v26 = vadd.f32 %v1230_v22, %v601_v25 }
0x1099   :  { %v606_v58 = vsel %vm605_vm3, %v1230_v22, %v602_v26 }
0x109a   :  { %v611_v31 = vsel %vm608_vm1, %v610_v29, %v606_v58 }
0x109b   :  { %v617_v38 = vmul.f32 %v615_v37, %v611_v31 }
0x10f8   :  { %v620_v30 = vpop.permute.xlu1 %619 }
0x10f9   :  { %v622_v32 = vmul.f32 %v620_v30, %v611_v31 }
0x10fb   :  { %624 = vrot.lane.b32.xlu2 %v622_v32, %s1282_s21 }
0x1155   :  { %v625_v39 = vpop.permute.xlu2 %624 }
0x1156   :  { %v627_v40 = vadd.f32 %v625_v39, %v617_v38 }
0x1158   :  { %1231 = vtanh.f32 %v627_v40  ;;  %v669_v41 = vrot.slane %v627_v40, 6 }
0x115a   :  { %670 = vrot.lane.b32.xlu2 %v669_v41, %s1284_s10 }
0x115e   :  { %v1232_v42 = vpop.eup %1231 }
0x115f   :  { %630 = vrot.lane.b32.xlu0 %v1232_v42, %s1282_s21 }
0x11b4   :  { %v671_v9 = vpop.permute.xlu2 %670 }
0x11b5   :  { %1146 = vmatmul.msk.f32.vlgmr.msra.gmra.mxu3 %vm87_vm6, %v671_v9 }
0x11d1   :  { %v631_v43 = vpop.permute.xlu0 %630 }
0x11d2   :  { %v633_v44 = vmul.f32 %v631_v43, %v611_v31 }
0x11d4   :  { %v639_v45 = vrot.slane %v633_v44, 6 }
0x11d6   :  { %640 = vrot.lane.b32.xlu1 %v639_v45, %s1283_s3 }
0x1238   :  { %v691_v51 = vpop.f32.mrf.mxu3 }
0x1239   :  { %v692_v52 = vadd.f32 %v1167_v50, %v691_v51 }
0x123b   :  { %744 = vrot.lane.b32.xlu2 %v692_v52, %s1282_s21 }
0x1248   :  { %v641_v53 = vpop.permute.xlu1 %640 }
0x1249   :  { %1145 = vmatmul.msk.f32.vlgmr.msra.gmra.mxu2 %vm87_vm6, %v641_v53 }
0x1295   :  { %v745_v16 = vpop.permute.xlu2 %744 }
0x12cc   :  { %v661_v57 = vpop.f32.mrf.mxu2 }
0x12cd   :  { %v1459_v59 = vadd.f32 %v1168_v56, %v661_v57 }
0x12cf   :  { %1147 = vmatmul.msk.f32.vlgmr.msra.gmra.mxu0 %vm694_vm4, %v1459_v59 }
0x134c   :  { %v715_v60 = vpop.f32.mrf.mxu0 }
0x134d   :  { %719 = vrot.lane.b32.xlu0 %v715_v60, %s1285_s8 }
0x13bf   :  { %v720_v61 = vpop.permute.xlu0 %719 }
0x13c0   :  { %v722_v62 = vadd.f32 %v720_v61, %v1459_v59 }
0x13c2   :  { %1233 = vtanh.f32 %v722_v62  ;;  %v1148_v0 = vmul.f32 -1.442695, %v722_v62 }
0x13c4   :  { %1235 = vpow2.f32 %v1148_v0 }
0x13c8   :  { %v1234_v63 = vpop.eup %1233 }
0x13c9   :  { %749 = vrot.lane.b32.xlu1 %v1234_v63, %s1286_s22 }
0x13ca   :  { %v1236_v1 = vpop.eup %1235 }
0x13cb   :  { %v726_v2 = vadd.f32 1.0, %v1236_v1 }
0x13cd   :  { %1237 = vrcp.f32 %v726_v2  ;;  %v738_v8 = vand.u32 2147483648, %v726_v2  ;;  %vm732_vm7 = vweird.f32 %v726_v2  ;;  %v736_v10 = vand.u32 2147483647, %v726_v2 }
0x13cf   :  { %v739_v12 = vor.u32 1.1754944e-38, %v738_v8  ;;  %vm737_vm9 = vcmp.eq.f32.partialorder %v736_v10, 8.507059e+37 }
0x13d3   :  { %v1238_v3 = vpop.eup %1237 }
0x13d4   :  { %v728_v4 = vmul.f32 %v1238_v3, %v726_v2  ;;  %vm733_vm5 = vweird.f32 %v1238_v3 }
0x13d5   :  { %vm734_vm8 = vmor %vm732_vm7, %vm733_vm5 }
0x13d6   :  { %v729_v5 = vsub.f32 1.0, %v728_v4 }
0x13d8   :  { %v730_v7 = vmul.f32 %v1238_v3, %v729_v5 }
0x13da   :  { %v731_v6 = vadd.f32 %v1238_v3, %v730_v7 }
0x13dc   :  { %v735_v11 = vsel %vm734_vm8, %v1238_v3, %v731_v6 }
0x13dd   :  { %v740_v14 = vsel %vm737_vm9, %v739_v12, %v735_v11 }
0x13de   :  { %v747_v17 = vmul.f32 %v745_v16, %v740_v14 }
0x143b   :  { %v750_v13 = vpop.permute.xlu1 %749 }
0x143c   :  { %v752_v15 = vmul.f32 %v750_v13, %v740_v14 }
0x143e   :  { %754 = vrot.lane.b32.xlu0 %v752_v15, %s1285_s8 }
0x14b0   :  { %v755_v18 = vpop.permute.xlu0 %754 }
0x14b1   :  { %v757_v19 = vadd.f32 %v755_v18, %v747_v17 }
0x14b3   :  { %1239 = vtanh.f32 %v757_v19 }
0x14b9   :  { %v1240_v20 = vpop.eup %1239 }
0x14ba   :  { %760 = vrot.lane.b32.xlu1 %v1240_v20, %s1285_s8 }
0x152c   :  { %v761_v21 = vpop.permute.xlu1 %760 }
0x152d   :  { %v763_v22 = vmul.f32 %v761_v21, %v740_v14 }
0x152f   :  { %765 = vrot.lane.b32.xlu2 %v763_v22, %s1286_s22 }
0x1589   :  { %v1469_v23 = vpop.permute.xlu2 %765 }
0x158a   :  { %1149 = vmatmul.msk.f32.vlgmr.msrb.gmra.mxu1 %vm694_vm4, %v1469_v23 }
0x1607   :  { %v786_v24 = vpop.f32.mrf.mxu1 }
0x1608   :  { %790 = vrot.lane.b32.xlu0 %v786_v24, %s1285_s8 }
0x167a   :  { %v791_v25 = vpop.permute.xlu0 %790 }
0x167b   :  { %v793_v26 = vadd.f32 %v791_v25, %v1459_v59 }
0x167d   :  { %1241 = vtanh.f32 %v793_v26  ;;  %v1150_v28 = vmul.f32 -1.442695, %v793_v26 }
0x167f   :  { %1243 = vpow2.f32 %v1150_v28 }
0x1683   :  { %v1242_v27 = vpop.eup %1241 }
0x1684   :  { %816 = vrot.lane.b32.xlu1 %v1242_v27, %s1286_s22 }
0x1685   :  { %v1244_v58 = vpop.eup %1243 }
0x1686   :  { %v797_v29 = vadd.f32 1.0, %v1244_v58 }
0x1688   :  { %1245 = vrcp.f32 %v797_v29  ;;  %v809_v35 = vand.u32 2147483648, %v797_v29  ;;  %vm803_vm11 = vweird.f32 %v797_v29  ;;  %v807_v36 = vand.u32 2147483647, %v797_v29 }
0x168a   :  { %v810_v38 = vor.u32 1.1754944e-38, %v809_v35  ;;  %vm808_vm13 = vcmp.eq.f32.partialorder %v807_v36, 8.507059e+37 }
0x168e   :  { %v1246_v30 = vpop.eup %1245 }
0x168f   :  { %v799_v31 = vmul.f32 %v1246_v30, %v797_v29  ;;  %vm804_vm10 = vweird.f32 %v1246_v30 }
0x1690   :  { %vm805_vm12 = vmor %vm803_vm11, %vm804_vm10 }
0x1691   :  { %v800_v32 = vsub.f32 1.0, %v799_v31 }
0x1693   :  { %v801_v33 = vmul.f32 %v1246_v30, %v800_v32 }
0x1695   :  { %v802_v34 = vadd.f32 %v1246_v30, %v801_v33 }
0x1697   :  { %v806_v37 = vsel %vm805_vm12, %v1246_v30, %v802_v34 }
0x1698   :  { %v811_v40 = vsel %vm808_vm13, %v810_v38, %v806_v37 }
0x1699   :  { %v814_v42 = vmul.f32 %v811_v40, %v757_v19 }
0x16f6   :  { %v817_v39 = vpop.permute.xlu1 %816 }
0x16f7   :  { %v819_v41 = vmul.f32 %v817_v39, %v811_v40 }
0x16f9   :  { %821 = vrot.lane.b32.xlu2 %v819_v41, %s1285_s8 }
0x1753   :  { %v822_v9 = vpop.permute.xlu2 %821 }
0x1754   :  { %v824_v43 = vadd.f32 %v822_v9, %v814_v42 }
0x1756   :  { %1247 = vtanh.f32 %v824_v43 }
0x175c   :  { %v1248_v44 = vpop.eup %1247 }
0x175d   :  { %827 = vrot.lane.b32.xlu0 %v1248_v44, %s1285_s8 }
0x17cf   :  { %v828_v45 = vpop.permute.xlu0 %827 }
0x17d0   :  { %v1478_v46 = vmul.f32 %v828_v45, %v811_v40 }
0x17d2   :  { %832 = vrot.lane.b32.xlu1 %v1478_v46, %s1286_s22 }
0x1844   :  { %v833_v47 = vpop.permute.xlu1 %832 }
0x1845   :  { %1151 = vmatmul.msk.f32.vlgmr.msrb.gmra.mxu2 %vm694_vm4, %v833_v47 }
0x18c8   :  { %v853_v48 = vpop.f32.mrf.mxu2 }
0x18c9   :  { %857 = vrot.lane.b32.xlu2 %v853_v48, %s1285_s8 }
0x1923   :  { %v858_v49 = vpop.permute.xlu2 %857 }
0x1924   :  { %v860_v50 = vadd.f32 %v858_v49, %v1459_v59 }
0x1926   :  { %1249 = vtanh.f32 %v860_v50  ;;  %v1152_v52 = vmul.f32 -1.442695, %v860_v50 }
0x1928   :  { %1251 = vpow2.f32 %v1152_v52 }
0x192c   :  { %v1250_v51 = vpop.eup %1249 }
0x192d   :  { %883 = vrot.lane.b32.xlu0 %v1250_v51, %s1286_s22 }
0x192e   :  { %v1252_v53 = vpop.eup %1251 }
0x192f   :  { %v864_v54 = vadd.f32 1.0, %v1252_v53 }
0x1931   :  { %1253 = vrcp.f32 %v864_v54  ;;  %v876_v62 = vand.u32 2147483648, %v864_v54  ;;  %vm870_vm15 = vweird.f32 %v864_v54  ;;  %v874_v63 = vand.u32 2147483647, %v864_v54 }
0x1933   :  { %v877_v1 = vor.u32 1.1754944e-38, %v876_v62  ;;  %vm875_vm2 = vcmp.eq.f32.partialorder %v874_v63, 8.507059e+37 }
0x1937   :  { %v1254_v55 = vpop.eup %1253 }
0x1938   :  { %v866_v56 = vmul.f32 %v1254_v55, %v864_v54  ;;  %vm871_vm14 = vweird.f32 %v1254_v55 }
0x1939   :  { %vm872_vm0 = vmor %vm870_vm15, %vm871_vm14 }
0x193a   :  { %v867_v57 = vsub.f32 1.0, %v866_v56 }
0x193c   :  { %v868_v60 = vmul.f32 %v1254_v55, %v867_v57 }
0x193e   :  { %v869_v61 = vadd.f32 %v1254_v55, %v868_v60 }
0x1940   :  { %v873_v0 = vsel %vm872_vm0, %v1254_v55, %v869_v61  ;;  %vm1115_vm0 = vcmask 392192  }
0x1941   :  { %v878_v3 = vsel %vm875_vm2, %v877_v1, %v873_v0  ;;  %vm1117_vm2 = vcmask 523264  }
0x1942   :  { %v881_v5 = vmul.f32 %v878_v3, %v824_v43 }
0x199f   :  { %v884_v2 = vpop.permute.xlu0 %883 }
0x19a0   :  { %v886_v4 = vmul.f32 %v884_v2, %v878_v3 }
0x19a2   :  { %888 = vrot.lane.b32.xlu1 %v886_v4, %s1285_s8 }
0x1a14   :  { %v889_v7 = vpop.permute.xlu1 %888 }
0x1a15   :  { %v891_v6 = vadd.f32 %v889_v7, %v881_v5 }
0x1a17   :  { %1255 = vtanh.f32 %v891_v6 }
0x1a1d   :  { %v1256_v8 = vpop.eup %1255 }
0x1a1e   :  { %894 = vrot.lane.b32.xlu2 %v1256_v8, %s1285_s8 }
0x1a78   :  { %v895_v10 = vpop.permute.xlu2 %894 }
0x1a79   :  { %v1488_v11 = vmul.f32 %v895_v10, %v878_v3 }
0x1a7b   :  { %899 = vrot.lane.b32.xlu0 %v1488_v11, %s1286_s22 }
0x1aed   :  { %v900_v12 = vpop.permute.xlu0 %899 }
0x1aee   :  { %1153 = vmatmul.msk.f32.vlgmr.msrb.gmra.mxu3 %vm694_vm4, %v900_v12 }
0x1b71   :  { %v920_v13 = vpop.f32.mrf.mxu3 }
0x1b72   :  { %924 = vrot.lane.b32.xlu1 %v920_v13, %s1285_s8 }
0x1be4   :  { %v925_v14 = vpop.permute.xlu1 %924 }
0x1be5   :  { %v927_v15 = vadd.f32 %v925_v14, %v1459_v59 }
0x1be7   :  { %1257 = vtanh.f32 %v927_v15  ;;  %v1154_v17 = vmul.f32 -1.442695, %v927_v15 }
0x1be9   :  { %1259 = vpow2.f32 %v1154_v17 }
0x1bed   :  { %v1258_v16 = vpop.eup %1257 }
0x1bee   :  { %950 = vrot.lane.b32.xlu2 %v1258_v16, %s1286_s22 }
0x1bef   :  { %v1260_v18 = vpop.eup %1259 }
0x1bf0   :  { %v931_v19 = vadd.f32 1.0, %v1260_v18 }
0x1bf2   :  { %1261 = vrcp.f32 %v931_v19  ;;  %v943_v26 = vand.u32 2147483648, %v931_v19  ;;  %vm937_vm1 = vweird.f32 %v931_v19  ;;  %v941_v27 = vand.u32 2147483647, %v931_v19 }
0x1bf4   :  { %v944_v58 = vor.u32 1.1754944e-38, %v943_v26  ;;  %vm942_vm7 = vcmp.eq.f32.partialorder %v941_v27, 8.507059e+37 }
0x1bf8   :  { %v1262_v20 = vpop.eup %1261 }
0x1bf9   :  { %v933_v21 = vmul.f32 %v1262_v20, %v931_v19  ;;  %vm938_vm3 = vweird.f32 %v1262_v20 }
0x1bfa   :  { %vm939_vm5 = vmor %vm937_vm1, %vm938_vm3  ;;  %vm1119_vm3 = vcmask 654336   ;;  %vm1121_vm1 = vcmask 779264  }
0x1bfb   :  { %v934_v22 = vsub.f32 1.0, %v933_v21 }
0x1bfd   :  { %v935_v24 = vmul.f32 %v1262_v20, %v934_v22 }
0x1bff   :  { %v936_v25 = vadd.f32 %v1262_v20, %v935_v24 }
0x1c01   :  { %v940_v28 = vsel %vm939_vm5, %v1262_v20, %v936_v25 }
0x1c02   :  { %v945_v30 = vsel %vm942_vm7, %v944_v58, %v940_v28 }
0x1c03   :  { %v948_v32 = vmul.f32 %v945_v30, %v891_v6 }
0x1c48   :  { %v951_v29 = vpop.permute.xlu2 %950 }
0x1c49   :  { %v953_v31 = vmul.f32 %v951_v29, %v945_v30 }
0x1c4b   :  { %955 = vrot.lane.b32.xlu0 %v953_v31, %s1285_s8 }
0x1cbd   :  { %v956_v33 = vpop.permute.xlu0 %955 }
0x1cbe   :  { %v958_v34 = vadd.f32 %v956_v33, %v948_v32 }
0x1cc0   :  { %1263 = vtanh.f32 %v958_v34 }
0x1cc6   :  { %v1264_v35 = vpop.eup %1263 }
0x1cc7   :  { %961 = vrot.lane.b32.xlu1 %v1264_v35, %s1285_s8 }
0x1d39   :  { %v962_v36 = vpop.permute.xlu1 %961 }
0x1d3a   :  { %v1498_v37 = vmul.f32 %v962_v36, %v945_v30 }
0x1d3c   :  { %966 = vrot.lane.b32.xlu2 %v1498_v37, %s1286_s22 }
0x1d96   :  { %v967_v38 = vpop.permute.xlu2 %966 }
0x1d97   :  { %1155 = vmatmul.msk.f32.vlgmr.msrb.gmra.mxu0 %vm694_vm4, %v967_v38 }
0x1e14   :  { %v987_v39 = vpop.f32.mrf.mxu0 }
0x1e15   :  { %991 = vrot.lane.b32.xlu0 %v987_v39, %s1285_s8 }
0x1e87   :  { %v992_v40 = vpop.permute.xlu0 %991 }
0x1e88   :  { %v994_v41 = vadd.f32 %v992_v40, %v1459_v59 }
0x1e8a   :  { %1265 = vtanh.f32 %v994_v41  ;;  %v1156_v9 = vmul.f32 -1.442695, %v994_v41 }
0x1e8c   :  { %1267 = vpow2.f32 %v1156_v9 }
0x1e90   :  { %v1266_v42 = vpop.eup %1265 }
0x1e91   :  { %1017 = vrot.lane.b32.xlu1 %v1266_v42, %s1286_s22 }
0x1e92   :  { %v1268_v43 = vpop.eup %1267 }
0x1e93   :  { %v998_v44 = vadd.f32 1.0, %v1268_v43 }
0x1e95   :  { %1269 = vrcp.f32 %v998_v44  ;;  %v1010_v51 = vand.u32 2147483648, %v998_v44  ;;  %vm1004_vm9 = vweird.f32 %v998_v44  ;;  %v1008_v52 = vand.u32 2147483647, %v998_v44 }
0x1e97   :  { %v1011_v54 = vor.u32 1.1754944e-38, %v1010_v51  ;;  %vm1009_vm11 = vcmp.eq.f32.partialorder %v1008_v52, 8.507059e+37 }
0x1e9b   :  { %v1270_v45 = vpop.eup %1269 }
0x1e9c   :  { %v1000_v47 = vmul.f32 %v1270_v45, %v998_v44  ;;  %vm1005_vm8 = vweird.f32 %v1270_v45 }
0x1e9d   :  { %vm1006_vm10 = vmor %vm1004_vm9, %vm1005_vm8 }
0x1e9e   :  { %v1001_v48 = vsub.f32 1.0, %v1000_v47 }
0x1ea0   :  { %v1002_v49 = vmul.f32 %v1270_v45, %v1001_v48 }
0x1ea2   :  { %v1003_v50 = vadd.f32 %v1270_v45, %v1002_v49 }
0x1ea4   :  { %v1007_v53 = vsel %vm1006_vm10, %v1270_v45, %v1003_v50 }
0x1ea5   :  { %v1012_v56 = vsel %vm1009_vm11, %v1011_v54, %v1007_v53 }
0x1ea6   :  { %v1015_v60 = vmul.f32 %v1012_v56, %v958_v34 }
0x1f03   :  { %v1018_v55 = vpop.permute.xlu1 %1017 }
0x1f04   :  { %v1020_v57 = vmul.f32 %v1018_v55, %v1012_v56 }
0x1f06   :  { %1022 = vrot.lane.b32.xlu2 %v1020_v57, %s1285_s8 }
0x1f60   :  { %v1023_v61 = vpop.permute.xlu2 %1022 }
0x1f61   :  { %v1025_v62 = vadd.f32 %v1023_v61, %v1015_v60 }
0x1f63   :  { %1271 = vtanh.f32 %v1025_v62 }
0x1f69   :  { %v1272_v63 = vpop.eup %1271 }
0x1f6a   :  { %1028 = vrot.lane.b32.xlu0 %v1272_v63, %s1285_s8 }
0x1fdc   :  { %v1029_v0 = vpop.permute.xlu0 %1028 }
0x1fdd   :  { %v1031_v1 = vmul.f32 %v1029_v0, %v1012_v56 }
0x1fdf   :  { %1033 = vrot.lane.b32.xlu1 %v1031_v1, %s1286_s22 }
0x2051   :  { %v1034_v2 = vpop.permute.xlu1 %1033 }
0x2052   :  { %1157 = vmatmul.msk.f32.vlgmr.msra.gmra.mxu1 %vm694_vm4, %v1034_v2 }
0x20cf   :  { %v1054_v3 = vpop.f32.mrf.mxu1 }
0x20d0   :  { %1058 = vrot.lane.b32.xlu2 %v1054_v3, %s1285_s8 }
0x212a   :  { %v1059_v4 = vpop.permute.xlu2 %1058 }
0x212b   :  { %v1061_v5 = vadd.f32 %v1059_v4, %v1459_v59 }
0x212d   :  { %1273 = vtanh.f32 %v1061_v5  ;;  %v1158_v6 = vmul.f32 -1.442695, %v1061_v5 }
0x212f   :  { %1275 = vpow2.f32 %v1158_v6 }
0x2133   :  { %v1274_v7 = vpop.eup %1273 }
0x2134   :  { %1084 = vrot.lane.b32.xlu0 %v1274_v7, %s1286_s22 }
0x2135   :  { %v1276_v8 = vpop.eup %1275 }
0x2136   :  { %v1065_v10 = vadd.f32 1.0, %v1276_v8 }
0x2138   :  { %1277 = vrcp.f32 %v1065_v10  ;;  %v1077_v17 = vand.u32 2147483648, %v1065_v10  ;;  %vm1071_vm13 = vweird.f32 %v1065_v10  ;;  %v1075_v59 = vand.u32 2147483647, %v1065_v10 }
0x213a   :  { %v1078_v19 = vor.u32 1.1754944e-38, %v1077_v17  ;;  %vm1076_vm15 = vcmp.eq.f32.partialorder %v1075_v59, 8.507059e+37 }
0x213c   :  { %1100 = vrot.lane.b32.xlu0 %v1478_v46, %s1284_s10 }
0x213e   :  { %v1278_v12 = vpop.eup %1277 }
0x213f   :  { %v1067_v13 = vmul.f32 %v1278_v12, %v1065_v10  ;;  %vm1072_vm12 = vweird.f32 %v1278_v12 }
0x2140   :  { %vm1073_vm14 = vmor %vm1071_vm13, %vm1072_vm12 }
0x2141   :  { %v1068_v14 = vsub.f32 1.0, %v1067_v13 }
0x2143   :  { %v1069_v15 = vmul.f32 %v1278_v12, %v1068_v14 }
0x2145   :  { %v1070_v16 = vadd.f32 %v1278_v12, %v1069_v15 }
0x2147   :  { %v1074_v18 = vsel %vm1073_vm14, %v1278_v12, %v1070_v16 }
0x2148   :  { %v1079_v46 = vsel %vm1076_vm15, %v1078_v19, %v1074_v18 }
0x2149   :  { %v1082_v22 = vmul.f32 %v1079_v46, %v1025_v62 }
0x21a6   :  { %v1085_v20 = vpop.permute.xlu0 %1084 }
0x21a7   :  { %v1087_v21 = vmul.f32 %v1085_v20, %v1079_v46 }
0x21a9   :  { %1089 = vrot.lane.b32.xlu1 %v1087_v21, %s1285_s8 }
0x21ae   :  { %v1101_v58 = vpop.permute.xlu0 %1100 }
0x21af   :  { %v1113_v30 = vsel %vm694_vm4, %v1469_v23, %v1101_v58 }
0x21b1   :  { %1103 = vrot.lane.b32.xlu1 %v1488_v11, %s1287_s5 }
0x221b   :  { %v1090_v24 = vpop.permute.xlu1 %1089 }
0x221c   :  { %v1092_v25 = vadd.f32 %v1090_v24, %v1082_v22 }
0x221e   :  { %1279 = vtanh.f32 %v1092_v25 }
0x2223   :  { %v1104_v29 = vpop.permute.xlu1 %1103 }
0x2224   :  { %v1280_v26 = vpop.eup %1279  ;;  %v1114_v11 = vsel %vm87_vm6, %v1113_v30, %v1104_v29 }
0x2225   :  { %1095 = vrot.lane.b32.xlu2 %v1280_v26, %s1285_s8  ;;  %v1116_v32 = vsel %vm1115_vm0, %v1114_v11, %v1498_v37 }
0x222d   :  { %1106 = vrot.lane.b32.xlu2 %v1031_v1, %s1285_s8 }
0x227f   :  { %v1096_v27 = vpop.permute.xlu2 %1095 }
0x2280   :  { %v1098_v28 = vmul.f32 %v1096_v27, %v1079_v46 }
0x2282   :  { %1110 = vrot.lane.b32.xlu0 %v1098_v28, %s1282_s21 }
0x2287   :  { %v1107_v31 = vpop.permute.xlu2 %1106 }
0x2288   :  { %v1118_v33 = vsel %vm1117_vm2, %v1116_v32, %v1107_v31 }
0x22f4   :  { %v1111_v34 = vpop.permute.xlu0 %1110 }
0x22f5   :  { %v1120_v35 = vsel %vm1119_vm3, %v1118_v33, %v1111_v34 }
0x22f6   :  { %1122 = vst.msk [vmem:[%s1536_s9] sm:$0x3] %vm1121_vm1, %v1120_v35 }

</bundles_post_ra>
